<compile_context>
chip_gen: v6e
topology: v6e:2x2x1
jax: 0.10.0
libtpu: 0.0.40
codegen_flags: <defaults>
</compile_context>

<pallas_src>
from itertools import product

import jax
import jax.numpy as jnp
from jax import lax
from jax.experimental import pallas as pl
from jax.experimental.pallas import tpu as pltpu

CPAD = 128                     # lane-dense padded output-channel width
KTAP = 32                      # 27 conv taps padded to 32 -> K = Cin*KTAP is lane friendly
TM_TARGET = 1024               # row-tile target (picker keeps it dividing M when possible)
VMEM_LIMIT = 32 * 1024 * 1024  # explicit scoped-VMEM budget (portable incl. v7x 64 MiB)

# Set to jnp.bfloat16 on v6e/v7x for ~2x MXU rate and half the patch HBM traffic
# (accumulation stays f32).  Default f32 so the script verifies tightly against the
# f32 reference on every generation (v5e has no bf16 VPU/EUP anyway).
MATMUL_DTYPE = jnp.float32


# ---------------------------------------------------------------- Pallas kernels
def _matmul_stats_kernel(a_ref, b_ref, y_ref, sum_ref, sq_ref):
    """Conv-as-matmul tile + fused per-tile BatchNorm statistics."""
    y = jnp.dot(a_ref[...], b_ref[...], preferred_element_type=jnp.float32)
    y_ref[...] = y
    s = jnp.sum(y, axis=0, keepdims=True)            # (1, C)
    q = jnp.sum(y * y, axis=0, keepdims=True)        # (1, C)
    sum_ref[...] = s.reshape(1, 1, s.shape[-1])
    sq_ref[...] = q.reshape(1, 1, q.shape[-1])


def _bn_relu_kernel(y_ref, scale_ref, shift_ref, o_ref):
    o_ref[...] = jnp.maximum(y_ref[...] * scale_ref[...] + shift_ref[...], 0.0)


# ---------------------------------------------------------------- helpers
def _pick_row_tile(m, target=TM_TARGET):
    """Row-tile choice: big tiles, no row padding if avoidable, and (when possible)
    at least 2 grid steps so the "parallel" axis can use both v7x TensorCores."""
    cap = max(8, min(target, m) - (min(target, m) % 8))
    # Prefer the largest divisor tile that still leaves >= 2 grid steps (megacore).
    for tm in range(cap, 7, -8):
        if m % tm == 0 and m // tm >= 2:
            return tm, m
    # Otherwise the largest divisor tile (single step, still no row-pad copy).
    for tm in range(cap, 7, -8):
        if m % tm == 0:
            return tm, m
    # Rare fallback: pad rows up to a multiple of cap.
    mp = pl.cdiv(m, cap) * cap
    return cap, mp


def _im2col_3d_cl(x_cl, c_valid):
    """Channels-last im2col.  x_cl: (N, D, H, W, C>=c_valid).

    Returns (N*D*H*W, c_valid*KTAP) patches; the tap axis is zero-padded 27->KTAP at
    stack time so the matmul K dimension is lane-aligned without an extra pad pass.
    Column order is (c, kd, kh, kw) to match PyTorch's Conv3d weight flattening.
    """
    # TODO(synk): for large D/H/W, fuse patch extraction into the matmul kernel
    # (halo DMA of the padded NDHWC input) instead of materializing the 27x blowup.
    N, D, H, W = x_cl.shape[:4]
    xv = x_cl[..., :c_valid]
    xp = jnp.pad(xv, ((0, 0), (1, 1), (1, 1), (1, 1), (0, 0)))
    slabs = [
        xp[:, kd:kd + D, kh:kh + H, kw:kw + W, :]
        for kd, kh, kw in product(range(3), repeat=3)
    ]
    slabs += [jnp.zeros_like(slabs[0])] * (KTAP - 27)
    p = jnp.stack(slabs, axis=-1)                    # (N, D, H, W, c_valid, KTAP)
    return p.reshape(N * D * H * W, c_valid * KTAP)


def _prep_weight(w):
    """(Cout, Cin, 3, 3, 3) -> (Cin*KTAP, CPAD), matching the patch column order and
    zero-padded to a lane-dense output width."""
    cout, cin = w.shape[0], w.shape[1]
    wk = w.reshape(cout, cin, 27)
    wk = jnp.pad(wk, ((0, 0), (0, 0), (0, KTAP - 27)))
    wmat = wk.reshape(cout, cin * KTAP).T            # (K, Cout)
    return jnp.pad(wmat, ((0, 0), (0, CPAD - cout))) # (K, CPAD)


# ---------------------------------------------------------------- one conv+BN+ReLU layer
def _conv_bn_relu_layer(x_cl, c_in, w, gamma, beta, eps=1e-5):
    """Conv3d(3x3x3, pad=1; bias dropped: cancels under batch-stat BN) + BN + ReLU.

    x_cl: channels-last (N, D, H, W, C>=c_in).  Returns a channel-padded channels-last
    activation (N, D, H, W, CPAD) and the number of valid output channels.
    """
    N, D, H, W = x_cl.shape[:4]
    cout = w.shape[0]
    assert cout <= CPAD
    m = N * D * H * W

    patches = _im2col_3d_cl(x_cl, c_in).astype(MATMUL_DTYPE)   # (m, K)
    k = patches.shape[1]
    wmat = _prep_weight(w).astype(MATMUL_DTYPE)                # (K, CPAD)

    tm, mp = _pick_row_tile(m)
    if mp != m:  # rare fallback; zero rows don't perturb BN sums (we divide by true m)
        patches = jnp.pad(patches, ((0, mp - m), (0, 0)))
    g = mp // tm

    cparams = pltpu.CompilerParams(
        dimension_semantics=("parallel",),
        vmem_limit_bytes=VMEM_LIMIT,
    )
    isz = jnp.dtype(MATMUL_DTYPE).itemsize
    mm_cost = pl.CostEstimate(
        flops=2 * mp * k * CPAD + 3 * mp * CPAD,          # matmul + fused stats
        transcendentals=0,
        bytes_accessed=mp * k * isz + k * CPAD * isz + mp * CPAD * 4 + 2 * g * CPAD * 4,
    )

    # --- fused matmul + per-tile BN statistics (y written once to HBM) ---
    y, tsum, tsq = pl.pallas_call(
        _matmul_stats_kernel,
        out_shape=(
            jax.ShapeDtypeStruct((mp, CPAD), jnp.float32),
            jax.ShapeDtypeStruct((g, 1, CPAD), jnp.float32),
            jax.ShapeDtypeStruct((g, 1, CPAD), jnp.float32),
        ),
        grid_spec=pltpu.PrefetchScalarGridSpec(
            num_scalar_prefetch=0,
            grid=(g,),
            in_specs=[
                pl.BlockSpec((tm, k), lambda i: (i, 0)),
                pl.BlockSpec((k, CPAD), lambda i: (0, 0)),
            ],
            out_specs=[
                pl.BlockSpec((tm, CPAD), lambda i: (i, 0)),
                pl.BlockSpec((1, 1, CPAD), lambda i: (i, 0, 0)),
                pl.BlockSpec((1, 1, CPAD), lambda i: (i, 0, 0)),
            ],
        ),
        compiler_params=cparams,
        cost_estimate=mm_cost,
    )(patches, wmat)

    # --- tiny (g, CPAD) reduction + BN coefficients in plain JAX (O(C) scalars) ---
    mean = jnp.sum(tsum, axis=(0, 1)) / m
    var = jnp.maximum(jnp.sum(tsq, axis=(0, 1)) / m - mean * mean, 0.0)
    gpad = jnp.pad(gamma, (0, CPAD - cout))
    bpad = jnp.pad(beta, (0, CPAD - cout))
    scale = gpad * lax.rsqrt(var + eps)
    shift = bpad - mean * scale

    bn_cost = pl.CostEstimate(
        flops=3 * mp * CPAD,
        transcendentals=0,
        bytes_accessed=2 * mp * CPAD * 4 + 2 * CPAD * 4,
    )

    # --- BN + ReLU applied in place over y (input_output_aliases) ---
    z = pl.pallas_call(
        _bn_relu_kernel,
        out_shape=jax.ShapeDtypeStruct((mp, CPAD), jnp.float32),
        grid_spec=pltpu.PrefetchScalarGridSpec(
            num_scalar_prefetch=0,
            grid=(g,),
            in_specs=[
                pl.BlockSpec((tm, CPAD), lambda i: (i, 0)),
                pl.BlockSpec((1, CPAD), lambda i: (0, 0)),
                pl.BlockSpec((1, CPAD), lambda i: (0, 0)),
            ],
            out_specs=pl.BlockSpec((tm, CPAD), lambda i: (i, 0)),
        ),
        input_output_aliases={0: 0},
        compiler_params=cparams,
        cost_estimate=bn_cost,
    )(y, scale.reshape(1, CPAD), shift.reshape(1, CPAD))

    z = z[:m].reshape(N, D, H, W, CPAD)
    return z, cout


def conv_block1(x, params):
    """x: (N, Cin, D, H, W) NCDHW -> (N, Cout, D, H, W) NCDHW (PyTorch ConvBlock1)."""
    c = x.shape[1]
    x_cl = jnp.transpose(x, (0, 2, 3, 4, 1))            # NCDHW -> NDHWC once
    z, c = _conv_bn_relu_layer(x_cl, c, params["w1"], params["g1"], params["be1"])
    z, c = _conv_bn_relu_layer(z, c, params["w2"], params["g2"], params["be2"])
    return jnp.transpose(z[..., :c], (0, 4, 1, 2, 3))   # strip channel pad, back to NCDHW


# ---------------------------------------------------------------- pure-JAX reference
def _ref_conv_bn_relu(x, w, b, gamma, beta, eps=1e-5):
    y = lax.conv_general_dilated(
        x, w, window_strides=(1, 1, 1), padding=[(1, 1)] * 3,
        dimension_numbers=("NCDHW", "OIDHW", "NCDHW"))
    y = y + b.reshape(1, -1, 1, 1, 1)
    mean = jnp.mean(y, axis=(0, 2, 3, 4), keepdims=True)
    var = jnp.mean((y - mean) ** 2, axis=(0, 2, 3, 4), keepdims=True)
    yn = (y - mean) / jnp.sqrt(var + eps)
    yn = yn * gamma.reshape(1, -1, 1, 1, 1) + beta.reshape(1, -1, 1, 1, 1)
    return jnp.maximum(yn, 0.0)


def _ref_block(x, p):
    out = _ref_conv_bn_relu(x, p["w1"], p["b1"], p["g1"], p["be1"])
    out = _ref_conv_bn_relu(out, p["w2"], p["b2"], p["g2"], p["be2"])
    return out


# ---------------------------------------------------------------- main
if __name__ == "__main__":
    key = jax.random.PRNGKey(0)
    N, Cin, Cout, D, H, W = 2, 4, 8, 8, 8, 8
    k = jax.random.split(key, 5)

    x = jax.random.normal(k[0], (N, Cin, D, H, W), jnp.float32)

    bound1 = 1.0 / float(jnp.sqrt(Cin * 27.0))
    bound2 = 1.0 / float(jnp.sqrt(Cout * 27.0))
    params = {
        "w1": jax.random.uniform(k[1], (Cout, Cin, 3, 3, 3), jnp.float32,
                                 -bound1, bound1),
        "b1": jax.random.uniform(k[2], (Cout,), jnp.float32, -bound1, bound1),
        "w2": jax.random.uniform(k[3], (Cout, Cout, 3, 3, 3), jnp.float32,
                                 -bound2, bound2),
        "b2": jax.random.uniform(k[4], (Cout,), jnp.float32, -bound2, bound2),
        "g1": jnp.ones((Cout,), jnp.float32),
        "be1": jnp.zeros((Cout,), jnp.float32),
        "g2": jnp.ones((Cout,), jnp.float32),
        "be2": jnp.zeros((Cout,), jnp.float32),
    }

    out = jax.jit(conv_block1)(x, params)
    out = jax.block_until_ready(out)

    ref = _ref_block(x, params)
    assert out.shape == (N, Cout, D, H, W)
    assert jnp.allclose(out, ref, atol=2e-3, rtol=2e-3), "mismatch vs reference"

    print("KERNEL_OK")
</pallas_src>

<mosaic_0001>
module attributes {stable_mosaic.version = 11 : i64} {
  func.func @_bn_relu_kernel(%arg0: i32, %arg1: memref<512x128xf32, #tpu.memory_space<vmem>>, %arg2: memref<1x128xf32, #tpu.memory_space<vmem>>, %arg3: memref<1x128xf32, #tpu.memory_space<vmem>>, %arg4: memref<512x128xf32, #tpu.memory_space<vmem>>) attributes {dimension_semantics = [#tpu.dimension_semantics<parallel>], iteration_bounds = array<i64: 2>, scalar_prefetch = 0 : i64, scratch_operands = 0 : i64, tpu.core_type = #tpu.core_type<tc>, window_params = [{transform_indices = @transform_0, window_bounds = array<i64: 512, 128>}, {pipeline_mode = #tpu.pipeline_mode<synchronous>, transform_indices = @transform_1, window_bounds = array<i64: 1, 128>}, {pipeline_mode = #tpu.pipeline_mode<synchronous>, transform_indices = @transform_2, window_bounds = array<i64: 1, 128>}, {transform_indices = @transform_3, window_bounds = array<i64: 512, 128>}]} {
    %c0 = arith.constant 0 : index
    %c0_0 = arith.constant 0 : index
    %0 = vector.load %arg1[%c0, %c0_0] : memref<512x128xf32, #tpu.memory_space<vmem>>, vector<512x128xf32>
    %c0_1 = arith.constant 0 : index
    %c0_2 = arith.constant 0 : index
    %1 = vector.load %arg2[%c0_1, %c0_2] : memref<1x128xf32, #tpu.memory_space<vmem>>, vector<1x128xf32>
    %2 = vector.broadcast %1 : vector<1x128xf32> to vector<512x128xf32>
    %3 = arith.mulf %0, %2 : vector<512x128xf32>
    %c0_3 = arith.constant 0 : index
    %c0_4 = arith.constant 0 : index
    %4 = vector.load %arg3[%c0_3, %c0_4] : memref<1x128xf32, #tpu.memory_space<vmem>>, vector<1x128xf32>
    %5 = vector.broadcast %4 : vector<1x128xf32> to vector<512x128xf32>
    %6 = arith.addf %3, %5 : vector<512x128xf32>
    %cst = arith.constant 0.000000e+00 : f32
    %7 = vector.broadcast %cst : f32 to vector<512x128xf32>
    %8 = arith.maximumf %6, %7 : vector<512x128xf32>
    %c0_5 = arith.constant 0 : index
    %c0_6 = arith.constant 0 : index
    %9 = vector.load %arg4[%c0_5, %c0_6] : memref<512x128xf32, #tpu.memory_space<vmem>>, vector<512x128xf32>
    tpu.vector_store %arg4[%c0_5, %c0_6], %8 {strides = array<i32>} : memref<512x128xf32, #tpu.memory_space<vmem>>, vector<512x128xf32>,
    return
  }
  func.func @transform_0(%arg0: i32) -> (i32, i32) {
    %c0_i32 = arith.constant 0 : i32
    %c0_i32_0 = arith.constant 0 : i32
    return %arg0, %c0_i32 : i32, i32
  }
  func.func @transform_1(%arg0: i32) -> (i32, i32) {
    %c0_i32 = arith.constant 0 : i32
    %c0_i32_0 = arith.constant 0 : i32
    %c0_i32_1 = arith.constant 0 : i32
    return %c0_i32, %c0_i32_0 : i32, i32
  }
  func.func @transform_2(%arg0: i32) -> (i32, i32) {
    %c0_i32 = arith.constant 0 : i32
    %c0_i32_0 = arith.constant 0 : i32
    %c0_i32_1 = arith.constant 0 : i32
    return %c0_i32, %c0_i32_0 : i32, i32
  }
  func.func @transform_3(%arg0: i32) -> (i32, i32) {
    %c0_i32 = arith.constant 0 : i32
    %c0_i32_0 = arith.constant 0 : i32
    return %arg0, %c0_i32 : i32, i32
  }
}

module attributes {stable_mosaic.version = 11 : i64} {
  func.func @_matmul_stats_kernel(%arg0: i32, %arg1: memref<512x128xf32, #tpu.memory_space<vmem>>, %arg2: memref<128x128xf32, #tpu.memory_space<vmem>>, %arg3: memref<512x128xf32, #tpu.memory_space<vmem>>, %arg4: memref<1x1x128xf32, #tpu.memory_space<vmem>>, %arg5: memref<1x1x128xf32, #tpu.memory_space<vmem>>) attributes {dimension_semantics = [#tpu.dimension_semantics<parallel>], iteration_bounds = array<i64: 2>, scalar_prefetch = 0 : i64, scratch_operands = 0 : i64, tpu.core_type = #tpu.core_type<tc>, window_params = [{transform_indices = @transform_0, window_bounds = array<i64: 512, 128>}, {pipeline_mode = #tpu.pipeline_mode<synchronous>, transform_indices = @transform_1, window_bounds = array<i64: 128, 128>}, {transform_indices = @transform_2, window_bounds = array<i64: 512, 128>}, {transform_indices = @transform_3, window_bounds = array<i64: 1, 1, 128>}, {transform_indices = @transform_4, window_bounds = array<i64: 1, 1, 128>}]} {
    %c0 = arith.constant 0 : index
    %c0_0 = arith.constant 0 : index
    %0 = vector.load %arg1[%c0, %c0_0] : memref<512x128xf32, #tpu.memory_space<vmem>>, vector<512x128xf32>
    %c0_1 = arith.constant 0 : index
    %c0_2 = arith.constant 0 : index
    %1 = vector.load %arg2[%c0_1, %c0_2] : memref<128x128xf32, #tpu.memory_space<vmem>>, vector<128x128xf32>
    %cst = arith.constant dense<0.000000e+00> : vector<512x128xf32>
    %2 = tpu.matmul %0, %1, %cst {dimension_numbers = #tpu.dot_dimension_numbers<[1], [0], [0], [1], [0, 0, 1, 1], [], []>} : vector<512x128xf32>, vector<128x128xf32>, vector<512x128xf32> -> vector<512x128xf32>
    %c0_3 = arith.constant 0 : index
    %c0_4 = arith.constant 0 : index
    %3 = vector.load %arg3[%c0_3, %c0_4] : memref<512x128xf32, #tpu.memory_space<vmem>>, vector<512x128xf32>
    tpu.vector_store %arg3[%c0_3, %c0_4], %2 {strides = array<i32>} : memref<512x128xf32, #tpu.memory_space<vmem>>, vector<512x128xf32>,
    %cst_5 = arith.constant dense<0.000000e+00> : vector<128xf32>
    %4 = vector.multi_reduction <add>, %2, %cst_5 [0] : vector<512x128xf32> to vector<128xf32>
    %5 = vector.shape_cast %4 : vector<128xf32> to vector<1x128xf32>
    %6 = arith.mulf %2, %2 : vector<512x128xf32>
    %cst_6 = arith.constant dense<0.000000e+00> : vector<128xf32>
    %7 = vector.multi_reduction <add>, %6, %cst_6 [0] : vector<512x128xf32> to vector<128xf32>
    %8 = vector.shape_cast %7 : vector<128xf32> to vector<1x128xf32>
    %9 = vector.shape_cast %5 : vector<1x128xf32> to vector<1x1x128xf32>
    %c0_7 = arith.constant 0 : index
    %c0_8 = arith.constant 0 : index
    %c0_9 = arith.constant 0 : index
    %10 = vector.load %arg4[%c0_7, %c0_8, %c0_9] : memref<1x1x128xf32, #tpu.memory_space<vmem>>, vector<1x1x128xf32>
    tpu.vector_store %arg4[%c0_7, %c0_8, %c0_9], %9 {strides = array<i32>} : memref<1x1x128xf32, #tpu.memory_space<vmem>>, vector<1x1x128xf32>,
    %11 = vector.shape_cast %8 : vector<1x128xf32> to vector<1x1x128xf32>
    %c0_10 = arith.constant 0 : index
    %c0_11 = arith.constant 0 : index
    %c0_12 = arith.constant 0 : index
    %12 = vector.load %arg5[%c0_10, %c0_11, %c0_12] : memref<1x1x128xf32, #tpu.memory_space<vmem>>, vector<1x1x128xf32>
    tpu.vector_store %arg5[%c0_10, %c0_11, %c0_12], %11 {strides = array<i32>} : memref<1x1x128xf32, #tpu.memory_space<vmem>>, vector<1x1x128xf32>,
    return
  }
  func.func @transform_0(%arg0: i32) -> (i32, i32) {
    %c0_i32 = arith.constant 0 : i32
    %c0_i32_0 = arith.constant 0 : i32
    return %arg0, %c0_i32 : i32, i32
  }
  func.func @transform_1(%arg0: i32) -> (i32, i32) {
    %c0_i32 = arith.constant 0 : i32
    %c0_i32_0 = arith.constant 0 : i32
    %c0_i32_1 = arith.constant 0 : i32
    return %c0_i32, %c0_i32_0 : i32, i32
  }
  func.func @transform_2(%arg0: i32) -> (i32, i32) {
    %c0_i32 = arith.constant 0 : i32
    %c0_i32_0 = arith.constant 0 : i32
    return %arg0, %c0_i32 : i32, i32
  }
  func.func @transform_3(%arg0: i32) -> (i32, i32, i32) {
    %c0_i32 = arith.constant 0 : i32
    %c0_i32_0 = arith.constant 0 : i32
    %c0_i32_1 = arith.constant 0 : i32
    return %arg0, %c0_i32, %c0_i32_0 : i32, i32, i32
  }
  func.func @transform_4(%arg0: i32) -> (i32, i32, i32) {
    %c0_i32 = arith.constant 0 : i32
    %c0_i32_0 = arith.constant 0 : i32
    %c0_i32_1 = arith.constant 0 : i32
    return %arg0, %c0_i32, %c0_i32_0 : i32, i32, i32
  }
}

module attributes {stable_mosaic.version = 11 : i64} {
  func.func @_matmul_stats_kernel(%arg0: i32, %arg1: memref<512x256xf32, #tpu.memory_space<vmem>>, %arg2: memref<256x128xf32, #tpu.memory_space<vmem>>, %arg3: memref<512x128xf32, #tpu.memory_space<vmem>>, %arg4: memref<1x1x128xf32, #tpu.memory_space<vmem>>, %arg5: memref<1x1x128xf32, #tpu.memory_space<vmem>>) attributes {dimension_semantics = [#tpu.dimension_semantics<parallel>], iteration_bounds = array<i64: 2>, scalar_prefetch = 0 : i64, scratch_operands = 0 : i64, tpu.core_type = #tpu.core_type<tc>, window_params = [{transform_indices = @transform_0, window_bounds = array<i64: 512, 256>}, {pipeline_mode = #tpu.pipeline_mode<synchronous>, transform_indices = @transform_1, window_bounds = array<i64: 256, 128>}, {transform_indices = @transform_2, window_bounds = array<i64: 512, 128>}, {transform_indices = @transform_3, window_bounds = array<i64: 1, 1, 128>}, {transform_indices = @transform_4, window_bounds = array<i64: 1, 1, 128>}]} {
    %c0 = arith.constant 0 : index
    %c0_0 = arith.constant 0 : index
    %0 = vector.load %arg1[%c0, %c0_0] : memref<512x256xf32, #tpu.memory_space<vmem>>, vector<512x256xf32>
    %c0_1 = arith.constant 0 : index
    %c0_2 = arith.constant 0 : index
    %1 = vector.load %arg2[%c0_1, %c0_2] : memref<256x128xf32, #tpu.memory_space<vmem>>, vector<256x128xf32>
    %cst = arith.constant dense<0.000000e+00> : vector<512x128xf32>
    %2 = tpu.matmul %0, %1, %cst {dimension_numbers = #tpu.dot_dimension_numbers<[1], [0], [0], [1], [0, 0, 1, 1], [], []>} : vector<512x256xf32>, vector<256x128xf32>, vector<512x128xf32> -> vector<512x128xf32>
    %c0_3 = arith.constant 0 : index
    %c0_4 = arith.constant 0 : index
    %3 = vector.load %arg3[%c0_3, %c0_4] : memref<512x128xf32, #tpu.memory_space<vmem>>, vector<512x128xf32>
    tpu.vector_store %arg3[%c0_3, %c0_4], %2 {strides = array<i32>} : memref<512x128xf32, #tpu.memory_space<vmem>>, vector<512x128xf32>,
    %cst_5 = arith.constant dense<0.000000e+00> : vector<128xf32>
    %4 = vector.multi_reduction <add>, %2, %cst_5 [0] : vector<512x128xf32> to vector<128xf32>
    %5 = vector.shape_cast %4 : vector<128xf32> to vector<1x128xf32>
    %6 = arith.mulf %2, %2 : vector<512x128xf32>
    %cst_6 = arith.constant dense<0.000000e+00> : vector<128xf32>
    %7 = vector.multi_reduction <add>, %6, %cst_6 [0] : vector<512x128xf32> to vector<128xf32>
    %8 = vector.shape_cast %7 : vector<128xf32> to vector<1x128xf32>
    %9 = vector.shape_cast %5 : vector<1x128xf32> to vector<1x1x128xf32>
    %c0_7 = arith.constant 0 : index
    %c0_8 = arith.constant 0 : index
    %c0_9 = arith.constant 0 : index
    %10 = vector.load %arg4[%c0_7, %c0_8, %c0_9] : memref<1x1x128xf32, #tpu.memory_space<vmem>>, vector<1x1x128xf32>
    tpu.vector_store %arg4[%c0_7, %c0_8, %c0_9], %9 {strides = array<i32>} : memref<1x1x128xf32, #tpu.memory_space<vmem>>, vector<1x1x128xf32>,
    %11 = vector.shape_cast %8 : vector<1x128xf32> to vector<1x1x128xf32>
    %c0_10 = arith.constant 0 : index
    %c0_11 = arith.constant 0 : index
    %c0_12 = arith.constant 0 : index
    %12 = vector.load %arg5[%c0_10, %c0_11, %c0_12] : memref<1x1x128xf32, #tpu.memory_space<vmem>>, vector<1x1x128xf32>
    tpu.vector_store %arg5[%c0_10, %c0_11, %c0_12], %11 {strides = array<i32>} : memref<1x1x128xf32, #tpu.memory_space<vmem>>, vector<1x1x128xf32>,
    return
  }
  func.func @transform_0(%arg0: i32) -> (i32, i32) {
    %c0_i32 = arith.constant 0 : i32
    %c0_i32_0 = arith.constant 0 : i32
    return %arg0, %c0_i32 : i32, i32
  }
  func.func @transform_1(%arg0: i32) -> (i32, i32) {
    %c0_i32 = arith.constant 0 : i32
    %c0_i32_0 = arith.constant 0 : i32
    %c0_i32_1 = arith.constant 0 : i32
    return %c0_i32, %c0_i32_0 : i32, i32
  }
  func.func @transform_2(%arg0: i32) -> (i32, i32) {
    %c0_i32 = arith.constant 0 : i32
    %c0_i32_0 = arith.constant 0 : i32
    return %arg0, %c0_i32 : i32, i32
  }
  func.func @transform_3(%arg0: i32) -> (i32, i32, i32) {
    %c0_i32 = arith.constant 0 : i32
    %c0_i32_0 = arith.constant 0 : i32
    %c0_i32_1 = arith.constant 0 : i32
    return %arg0, %c0_i32, %c0_i32_0 : i32, i32, i32
  }
  func.func @transform_4(%arg0: i32) -> (i32, i32, i32) {
    %c0_i32 = arith.constant 0 : i32
    %c0_i32_0 = arith.constant 0 : i32
    %c0_i32_1 = arith.constant 0 : i32
    return %arg0, %c0_i32, %c0_i32_0 : i32, i32, i32
  }
}

</mosaic_0001>

<bundles_post_ra>
// kernel: conv_block1.5
= control target key start
LH: loop header
LB: loop body
LE: loop exit
PB: predicated region body
PF: predicated region fallthrough
CT: control target
= control target key end

     0   :  { %s613_s12 = smov 0   ;;  %s1122_s0 = inlined_call_operand.vmem [shape: f32[1024,128], index: 0, kind: input, shape index: {}, may-alias: {0,3}]   ;;  %s1123_s1 = inlined_call_operand.vmem [shape: f32[1,128], index: 1, kind: input, shape index: {}]   ;;  %s1124_s2 = inlined_call_operand.vmem [shape: f32[1,128], index: 2, kind: input, shape index: {}]   ;;  %s1125_s3 = inlined_call_operand.vmem [shape: f32[1024,128], index: 3, kind: output, shape index: {}, may-alias: {0,3}]  }
   0x1 LB: > { %s564_s13 = sadd.s32 4294967295, %s591_s12   ;;  %p568_p0 = scmp.ge.s32.totalorder %s591_s12, 1  ;;  %s591_s12 = sphi %s613_s12, %s13_s12  }
   0x2   : > { %p138_p1 = scmp.lt.s32.totalorder %s591_s12, 3 }
   0x4   : > { %p139_p2 = pnand %p568_p0, %p138_p1 }
   0x6   : > { %142 = sbr.rel (%p139_p2) target bundleno = 73 (0x49), region = 32 }
   0xb   : > { %s569_s14 = sshll.u32 %s564_s13, 6  ;;  %v627_v0 = vld [vmem:[%s1123_s1] ss:$0 sm:$0xff] }
   0xc   : > { %p163_p3 = scmp.lt.s32.totalorder %s569_s14, 127  ;;  %v639_v1 = vld [vmem:[%s1124_s2] ss:$0 sm:$0xff] }
   0xe   : > { %s1167_s14 = smov (!%p163_p3, %s569_s14), 127 }
   0xf   : > { %s570_s15 = sshll.u32 %s1167_s14, 3 }
  0x10   : > { %s634_s20 = scalar_lea.vmem %s1122_s0, %s570_s15  ;;  %s798_s25 = scalar_lea.vmem %s1125_s3, %s570_s15 }
  0x11   : > { %v174_v2 = vld [vmem:[%s634_s20] sm:$0xff]  ;;  %v175_v3 = vld [vmem:[%s634_s20 + $0x8] sm:$0xff]  ;;  %v176_v4 = vld [vmem:[%s634_s20 + $0x10] sm:$0xff] }
  0x12   : > { %v177_v5 = vld [vmem:[%s634_s20 + $0x18] sm:$0xff]  ;;  %v178_v6 = vld [vmem:[%s634_s20 + $0x20] sm:$0xff]  ;;  %v179_v7 = vld [vmem:[%s634_s20 + $0x28] sm:$0xff]  ;;  %v245_v8 = vmul.f32 %v627_v0, %v174_v2  ;;  %v246_v9 = vmul.f32 %v627_v0, %v175_v3  ;;  %v247_v10 = vmul.f32 %v627_v0, %v176_v4 }
  0x13   : > { %v180_v11 = vld [vmem:[%s634_s20 + $0x30] sm:$0xff]  ;;  %v181_v12 = vld [vmem:[%s634_s20 + $0x38] sm:$0xff]  ;;  %v248_v13 = vmul.f32 %v627_v0, %v177_v5  ;;  %v249_v14 = vmul.f32 %v627_v0, %v178_v6  ;;  %v250_v15 = vmul.f32 %v627_v0, %v179_v7  ;;  %v182_v20 = vld [vmem:[%s634_s20 + $0x40] sm:$0xff] }
  0x14   : > { %v656_v16 = vadd.f32 %v639_v1, %v245_v8  ;;  %v659_v17 = vadd.f32 %v639_v1, %v246_v9  ;;  %v662_v18 = vadd.f32 %v639_v1, %v247_v10  ;;  %v251_v19 = vmul.f32 %v627_v0, %v180_v11  ;;  %v183_v21 = vld [vmem:[%s634_s20 + $0x48] sm:$0xff]  ;;  %v184_v22 = vld [vmem:[%s634_s20 + $0x50] sm:$0xff]  ;;  %v185_v27 = vld [vmem:[%s634_s20 + $0x58] sm:$0xff] }
  0x15   : > { %v669_v23 = vadd.f32 %v639_v1, %v248_v13  ;;  %v672_v24 = vadd.f32 %v639_v1, %v249_v14  ;;  %v675_v25 = vadd.f32 %v639_v1, %v250_v15  ;;  %v252_v26 = vmul.f32 %v627_v0, %v181_v12  ;;  %v186_v28 = vld [vmem:[%s634_s20 + $0x60] sm:$0xff]  ;;  %v187_v29 = vld [vmem:[%s634_s20 + $0x68] sm:$0xff]  ;;  %v188_v34 = vld [vmem:[%s634_s20 + $0x70] sm:$0xff] }
  0x16   : > { %v685_v33 = vadd.f32 %v639_v1, %v251_v19  ;;  %v189_v39 = vld [vmem:[%s634_s20 + $0x78] sm:$0xff]  ;;  %v253_v41 = vmul.f32 %v627_v0, %v182_v20  ;;  %v254_v42 = vmul.f32 %v627_v0, %v183_v21  ;;  %v255_v43 = vmul.f32 %v627_v0, %v184_v22  ;;  %v190_v52 = vld [vmem:[%s634_s20 + $0x80] sm:$0xff]  ;;  %v191_v53 = vld [vmem:[%s634_s20 + $0x88] sm:$0xff] }
  0x17   : > { %v692_v38 = vadd.f32 %v639_v1, %v252_v26  ;;  %v256_v45 = vmul.f32 %v627_v0, %v185_v27  ;;  %v257_v46 = vmul.f32 %v627_v0, %v186_v28  ;;  %v258_v47 = vmul.f32 %v627_v0, %v187_v29  ;;  %v192_v54 = vld [vmem:[%s634_s20 + $0x90] sm:$0xff]  ;;  %v193_v59 = vld [vmem:[%s634_s20 + $0x98] sm:$0xff]  ;;  %v194_v60 = vld [vmem:[%s634_s20 + $0xa0] sm:$0xff] }
  0x18   : > { %v704_v48 = vadd.f32 %v639_v1, %v253_v41  ;;  %v707_v49 = vadd.f32 %v639_v1, %v254_v42  ;;  %v710_v50 = vadd.f32 %v639_v1, %v255_v43  ;;  %v259_v51 = vmul.f32 %v627_v0, %v188_v34  ;;  %v195_v61 = vld [vmem:[%s634_s20 + $0xa8] sm:$0xff]  ;;  %v196_v4 = vld [vmem:[%s634_s20 + $0xb0] sm:$0xff]  ;;  %v197_v9 = vld [vmem:[%s634_s20 + $0xb8] sm:$0xff] }
  0x19   : > { %v717_v55 = vadd.f32 %v639_v1, %v256_v45  ;;  %v720_v56 = vadd.f32 %v639_v1, %v257_v46  ;;  %v723_v57 = vadd.f32 %v639_v1, %v258_v47  ;;  %v260_v58 = vmul.f32 %v627_v0, %v189_v39  ;;  %v198_v28 = vld [vmem:[%s634_s20 + $0xc0] sm:$0xff]  ;;  %v199_v29 = vld [vmem:[%s634_s20 + $0xc8] sm:$0xff]  ;;  %v200_v34 = vld [vmem:[%s634_s20 + $0xd0] sm:$0xff] }
  0x1a   : > { %v733_v3 = vadd.f32 %v639_v1, %v259_v51  ;;  %v261_v11 = vmul.f32 %v627_v0, %v190_v52  ;;  %v262_v12 = vmul.f32 %v627_v0, %v191_v53  ;;  %v263_v13 = vmul.f32 %v627_v0, %v192_v54  ;;  %v201_v45 = vld [vmem:[%s634_s20 + $0xd8] sm:$0xff]  ;;  %v202_v46 = vld [vmem:[%s634_s20 + $0xe0] sm:$0xff]  ;;  %v203_v47 = vld [vmem:[%s634_s20 + $0xe8] sm:$0xff] }
  0x1b   : > { %v740_v8 = vadd.f32 %v639_v1, %v260_v58  ;;  %v264_v15 = vmul.f32 %v627_v0, %v193_v59  ;;  %v265_v19 = vmul.f32 %v627_v0, %v194_v60  ;;  %v266_v20 = vmul.f32 %v627_v0, %v195_v61  ;;  %v204_v58 = vld [vmem:[%s634_s20 + $0xf0] sm:$0xff]  ;;  %v785_v59 = vld [vmem:[%s634_s20 + $0xf8] sm:$0xff]  ;;  %v828_v61 = vld [vmem:[%s634_s20 + $0x148] sm:$0xff] }
  0x1c   : > { %v752_v21 = vadd.f32 %v639_v1, %v261_v11  ;;  %v755_v22 = vadd.f32 %v639_v1, %v262_v12  ;;  %v758_v26 = vadd.f32 %v639_v1, %v263_v13  ;;  %v267_v27 = vmul.f32 %v627_v0, %v196_v4  ;;  %v801_v11 = vld [vmem:[%s634_s20 + $0x100] sm:$0xff]  ;;  %v804_v12 = vld [vmem:[%s634_s20 + $0x108] sm:$0xff]  ;;  %v807_v13 = vld [vmem:[%s634_s20 + $0x110] sm:$0xff] }
  0x1d   : > { %v765_v39 = vadd.f32 %v639_v1, %v264_v15  ;;  %v768_v41 = vadd.f32 %v639_v1, %v265_v19  ;;  %v771_v42 = vadd.f32 %v639_v1, %v266_v20  ;;  %v268_v43 = vmul.f32 %v627_v0, %v197_v9  ;;  %v810_v15 = vld [vmem:[%s634_s20 + $0x118] sm:$0xff]  ;;  %v813_v19 = vld [vmem:[%s634_s20 + $0x120] sm:$0xff]  ;;  %v816_v20 = vld [vmem:[%s634_s20 + $0x128] sm:$0xff] }
  0x1e   : > { %v781_v54 = vadd.f32 %v639_v1, %v267_v27  ;;  %v819_v27 = vld [vmem:[%s634_s20 + $0x130] sm:$0xff]  ;;  %v825_v4 = vld [vmem:[%s634_s20 + $0x140] sm:$0xff]  ;;  %v834_v53 = vld [vmem:[%s634_s20 + $0x158] sm:$0xff]  ;;  %v269_v32 = vmul.f32 %v627_v0, %v198_v28  ;;  %v270_v31 = vmul.f32 %v627_v0, %v199_v29  ;;  %v271_v30 = vmul.f32 %v627_v0, %v200_v34 }
  0x1f   : > { %v791_v9 = vadd.f32 %v639_v1, %v268_v43  ;;  %v822_v43 = vld [vmem:[%s634_s20 + $0x138] sm:$0xff]  ;;  %v831_v60 = vld [vmem:[%s634_s20 + $0x150] sm:$0xff]  ;;  %v837_v52 = vld [vmem:[%s634_s20 + $0x160] sm:$0xff]  ;;  %v272_v28 = vmul.f32 %v627_v0, %v201_v45  ;;  %v273_v29 = vmul.f32 %v627_v0, %v202_v46  ;;  %v274_v34 = vmul.f32 %v627_v0, %v203_v47 }
  0x20   : > { %v840_v51 = vld [vmem:[%s634_s20 + $0x168] sm:$0xff]  ;;  %v843_v14 = vld [vmem:[%s634_s20 + $0x170] sm:$0xff]  ;;  %v846_v10 = vld [vmem:[%s634_s20 + $0x178] sm:$0xff]  ;;  %v402_v35 = vmax.f32 %v781_v54, 0.0  ;;  %v341_v45 = vadd.f32 %v639_v1, %v270_v31  ;;  %v342_v46 = vadd.f32 %v639_v1, %v271_v30  ;;  %v275_v47 = vmul.f32 %v627_v0, %v204_v58 }
  0x21   : > { %v849_v7 = vld [vmem:[%s634_s20 + $0x180] sm:$0xff]  ;;  %v852_v6 = vld [vmem:[%s634_s20 + $0x188] sm:$0xff]  ;;  %v855_v5 = vld [vmem:[%s634_s20 + $0x190] sm:$0xff]  ;;  %v1138_v31 = vmax.f32 %v669_v23, 0.0  ;;  %v1139_v30 = vmax.f32 %v672_v24, 0.0  ;;  %v1143_v23 = vmax.f32 %v704_v48, 0.0 }
  0x22   : > { %v858_v2 = vld [vmem:[%s634_s20 + $0x198] sm:$0xff]  ;;  %v861_v63 = vld [vmem:[%s634_s20 + $0x1a0] sm:$0xff]  ;;  %v864_v62 = vld [vmem:[%s634_s20 + $0x1a8] sm:$0xff]  ;;  %v1144_v24 = vmax.f32 %v707_v49, 0.0  ;;  %v1151_v48 = vmax.f32 %v752_v21, 0.0  ;;  %v1152_v49 = vmax.f32 %v755_v22, 0.0  ;;  %v345_v21 = vadd.f32 %v639_v1, %v274_v34 }
  0x23   : > { %1126 = vst [vmem:[#allocation2_spill] sm:$0xff] %v864_v62  ;;  %v867_v44 = vld [vmem:[%s634_s20 + $0x1b0] sm:$0xff]  ;;  %v870_v40 = vld [vmem:[%s634_s20 + $0x1b8] sm:$0xff]  ;;  %v873_v37 = vld [vmem:[%s634_s20 + $0x1c0] sm:$0xff]  ;;  %v276_v22 = vmul.f32 %v627_v0, %v785_v59  ;;  %v277_v59 = vmul.f32 %v627_v0, %v801_v11  ;;  %v278_v34 = vmul.f32 %v627_v0, %v804_v12 }
  0x24   : > { %1127 = vst [vmem:[#allocation3_spill] sm:$0xff] %v867_v44  ;;  %1128 = vst [vmem:[#allocation4_spill] sm:$0xff] %v870_v40  ;;  %v876_v36 = vld [vmem:[%s634_s20 + $0x1c8] sm:$0xff]  ;;  %v883_v62 = vld [vmem:[%s634_s20 + $0x1d0] sm:$0xff] }
  0x25   : > { %1129 = vst [vmem:[#allocation5_spill] sm:$0xff] %v876_v36  ;;  %v886_v44 = vld [vmem:[%s634_s20 + $0x1d8] sm:$0xff]  ;;  %v889_v40 = vld [vmem:[%s634_s20 + $0x1e0] sm:$0xff]  ;;  %v403_v36 = vmax.f32 %v791_v9, 0.0  ;;  %v896_v54 = vld [vmem:[%s634_s20 + $0x1e8] sm:$0xff]  ;;  %v340_v9 = vadd.f32 %v639_v1, %v269_v32  ;;  %v1145_v32 = vmax.f32 %v710_v50, 0.0  ;;  %v348_v11 = vadd.f32 %v639_v1, %v277_v59 }
  0x26   : > { %1130 = vst [vmem:[#allocation6_spill] sm:$0xff] %v886_v44  ;;  %1131 = vst [vmem:[#allocation7_spill] sm:$0xff] %v889_v40  ;;  %v899_v44 = vld [vmem:[%s634_s20 + $0x1f0] sm:$0xff]  ;;  %v902_v40 = vld [vmem:[%s634_s20 + $0x1f8] sm:$0xff]  ;;  %v1153_v50 = vmax.f32 %v758_v26, 0.0  ;;  %v349_v12 = vadd.f32 %v639_v1, %v278_v34 }
  0x27   : > { %1132 = vst [vmem:[#allocation8_spill] sm:$0xff] %v896_v54  ;;  %1133 = vst [vmem:[#allocation9_spill] sm:$0xff] %v899_v44  ;;  %v1135_v54 = vmax.f32 %v656_v16, 0.0  ;;  %v1136_v44 = vmax.f32 %v659_v17, 0.0  ;;  %v1140_v16 = vmax.f32 %v675_v25, 0.0  ;;  %v1141_v17 = vmax.f32 %v685_v33, 0.0 }
  0x28   : > { %1134 = vst [vmem:[#allocation10_spill] sm:$0xff] %v902_v40  ;;  %v1137_v40 = vmax.f32 %v662_v18, 0.0  ;;  %447 = vst [vmem:[%s798_s25 + $0x18] sm:$0xff] %v1138_v31  ;;  %v1142_v18 = vmax.f32 %v692_v38, 0.0  ;;  %v1146_v25 = vmax.f32 %v717_v55, 0.0  ;;  %v1147_v33 = vmax.f32 %v720_v56, 0.0 }
  0x29   : > { %444 = vst [vmem:[%s798_s25] sm:$0xff] %v1135_v54  ;;  %445 = vst [vmem:[%s798_s25 + $0x8] sm:$0xff] %v1136_v44  ;;  %v1148_v38 = vmax.f32 %v723_v57, 0.0  ;;  %v1150_v44 = vmax.f32 %v740_v8, 0.0  ;;  %v1154_v55 = vmax.f32 %v765_v39, 0.0  ;;  %v1155_v56 = vmax.f32 %v768_v41, 0.0 }
  0x2a   : > { %446 = vst [vmem:[%s798_s25 + $0x10] sm:$0xff] %v1137_v40  ;;  %448 = vst [vmem:[%s798_s25 + $0x20] sm:$0xff] %v1139_v30  ;;  %v1149_v40 = vmax.f32 %v733_v3, 0.0  ;;  %v1156_v57 = vmax.f32 %v771_v42, 0.0  ;;  %v343_v3 = vadd.f32 %v639_v1, %v272_v28  ;;  %v344_v8 = vadd.f32 %v639_v1, %v273_v29 }
  0x2b   : > { %449 = vst [vmem:[%s798_s25 + $0x28] sm:$0xff] %v1140_v16  ;;  %450 = vst [vmem:[%s798_s25 + $0x30] sm:$0xff] %v1141_v17  ;;  %v404_v26 = vmax.f32 %v340_v9, 0.0  ;;  %v405_v39 = vmax.f32 %v341_v45, 0.0  ;;  %v406_v41 = vmax.f32 %v342_v46, 0.0  ;;  %v346_v42 = vadd.f32 %v639_v1, %v275_v47  ;;  %v1158_v34 = vld [vmem:[#allocation3_spill] sm:$0xff] }
  0x2c   : > { %451 = vst [vmem:[%s798_s25 + $0x38] sm:$0xff] %v1142_v18  ;;  %452 = vst [vmem:[%s798_s25 + $0x40] sm:$0xff] %v1143_v23  ;;  %v408_v58 = vmax.f32 %v344_v8, 0.0  ;;  %v347_v28 = vadd.f32 %v639_v1, %v276_v22  ;;  %v279_v54 = vmul.f32 %v627_v0, %v807_v13  ;;  %v280_v45 = vmul.f32 %v627_v0, %v810_v15 }
  0x2d   : > { %453 = vst [vmem:[%s798_s25 + $0x48] sm:$0xff] %v1144_v24  ;;  %454 = vst [vmem:[%s798_s25 + $0x50] sm:$0xff] %v1145_v32  ;;  %v410_v29 = vmax.f32 %v346_v42, 0.0  ;;  %v281_v46 = vmul.f32 %v627_v0, %v813_v19  ;;  %v282_v47 = vmul.f32 %v627_v0, %v816_v20  ;;  %v283_v31 = vmul.f32 %v627_v0, %v819_v27 }
  0x2e   : > { %455 = vst [vmem:[%s798_s25 + $0x58] sm:$0xff] %v1146_v25  ;;  %456 = vst [vmem:[%s798_s25 + $0x60] sm:$0xff] %v1147_v33  ;;  %v411_v9 = vmax.f32 %v347_v28, 0.0  ;;  %v350_v13 = vadd.f32 %v639_v1, %v279_v54  ;;  %v351_v15 = vadd.f32 %v639_v1, %v280_v45  ;;  %v284_v30 = vmul.f32 %v627_v0, %v822_v43  ;;  %v1159_v45 = vld [vmem:[#allocation4_spill] sm:$0xff] }
  0x2f   : > { %457 = vst [vmem:[%s798_s25 + $0x68] sm:$0xff] %v1148_v38  ;;  %458 = vst [vmem:[%s798_s25 + $0x70] sm:$0xff] %v1149_v40  ;;  %v352_v19 = vadd.f32 %v639_v1, %v281_v46  ;;  %v353_v20 = vadd.f32 %v639_v1, %v282_v47  ;;  %v412_v16 = vmax.f32 %v348_v11, 0.0  ;;  %v413_v17 = vmax.f32 %v349_v12, 0.0 }
  0x30   : > { %459 = vst [vmem:[%s798_s25 + $0x78] sm:$0xff] %v1150_v44  ;;  %460 = vst [vmem:[%s798_s25 + $0x80] sm:$0xff] %v1151_v48  ;;  %v414_v18 = vmax.f32 %v350_v13, 0.0  ;;  %v354_v23 = vadd.f32 %v639_v1, %v283_v31  ;;  %v415_v27 = vmax.f32 %v351_v15, 0.0  ;;  %v355_v25 = vadd.f32 %v639_v1, %v284_v30 }
  0x31   : > { %461 = vst [vmem:[%s798_s25 + $0x88] sm:$0xff] %v1152_v49  ;;  %462 = vst [vmem:[%s798_s25 + $0x90] sm:$0xff] %v1153_v50  ;;  %v416_v24 = vmax.f32 %v352_v19, 0.0  ;;  %v417_v32 = vmax.f32 %v353_v20, 0.0  ;;  %v285_v43 = vmul.f32 %v627_v0, %v825_v4  ;;  %v286_v38 = vmul.f32 %v627_v0, %v828_v61 }
  0x32   : > { %463 = vst [vmem:[%s798_s25 + $0x98] sm:$0xff] %v1154_v55  ;;  %464 = vst [vmem:[%s798_s25 + $0xa0] sm:$0xff] %v1155_v56  ;;  %v418_v33 = vmax.f32 %v354_v23, 0.0  ;;  %v287_v40 = vmul.f32 %v627_v0, %v831_v60  ;;  %v419_v44 = vmax.f32 %v355_v25, 0.0  ;;  %v288_v48 = vmul.f32 %v627_v0, %v834_v53  ;;  %v1162_v25 = vld [vmem:[#allocation7_spill] sm:$0xff] }
  0x33   : > { %465 = vst [vmem:[%s798_s25 + $0xa8] sm:$0xff] %v1156_v57  ;;  %466 = vst [vmem:[%s798_s25 + $0xb0] sm:$0xff] %v402_v35  ;;  %v407_v35 = vmax.f32 %v343_v3, 0.0  ;;  %v289_v49 = vmul.f32 %v627_v0, %v837_v52  ;;  %v290_v50 = vmul.f32 %v627_v0, %v840_v51  ;;  %v356_v4 = vadd.f32 %v639_v1, %v285_v43  ;;  %v1163_v43 = vld [vmem:[#allocation8_spill] sm:$0xff] }
  0x34   : > { %467 = vst [vmem:[%s798_s25 + $0xb8] sm:$0xff] %v403_v36  ;;  %v409_v36 = vmax.f32 %v345_v21, 0.0  ;;  %468 = vst [vmem:[%s798_s25 + $0xc0] sm:$0xff] %v404_v26  ;;  %v357_v61 = vadd.f32 %v639_v1, %v286_v38  ;;  %v358_v60 = vadd.f32 %v639_v1, %v287_v40  ;;  %v291_v55 = vmul.f32 %v627_v0, %v843_v14 }
  0x35   : > { %469 = vst [vmem:[%s798_s25 + $0xc8] sm:$0xff] %v405_v39  ;;  %470 = vst [vmem:[%s798_s25 + $0xd0] sm:$0xff] %v406_v41  ;;  %v359_v53 = vadd.f32 %v639_v1, %v288_v48  ;;  %v360_v52 = vadd.f32 %v639_v1, %v289_v49  ;;  %v361_v51 = vadd.f32 %v639_v1, %v290_v50  ;;  %v420_v57 = vmax.f32 %v356_v4, 0.0 }
  0x36   : > { %471 = vst [vmem:[%s798_s25 + $0xd8] sm:$0xff] %v407_v35  ;;  %472 = vst [vmem:[%s798_s25 + $0xe0] sm:$0xff] %v408_v58  ;;  %v292_v56 = vmul.f32 %v627_v0, %v846_v10  ;;  %v421_v3 = vmax.f32 %v357_v61, 0.0  ;;  %v422_v8 = vmax.f32 %v358_v60, 0.0  ;;  %v362_v21 = vadd.f32 %v639_v1, %v291_v55  ;;  %v1165_v61 = vld [vmem:[#allocation10_spill] sm:$0xff] }
  0x37   : > { %473 = vst [vmem:[%s798_s25 + $0xe8] sm:$0xff] %v409_v36  ;;  %474 = vst [vmem:[%s798_s25 + $0xf0] sm:$0xff] %v410_v29  ;;  %v423_v14 = vmax.f32 %v359_v53, 0.0  ;;  %v424_v22 = vmax.f32 %v360_v52, 0.0  ;;  %v425_v26 = vmax.f32 %v361_v51, 0.0  ;;  %v293_v10 = vmul.f32 %v627_v0, %v849_v7  ;;  %v1157_v29 = vld [vmem:[#allocation2_spill] sm:$0xff] }
  0x38   : > { %475 = vst [vmem:[%s798_s25 + $0xf8] sm:$0xff] %v411_v9  ;;  %476 = vst [vmem:[%s798_s25 + $0x100] sm:$0xff] %v412_v16  ;;  %v363_v39 = vadd.f32 %v639_v1, %v292_v56  ;;  %v426_v41 = vmax.f32 %v362_v21, 0.0  ;;  %v294_v42 = vmul.f32 %v627_v0, %v852_v6  ;;  %v295_v35 = vmul.f32 %v627_v0, %v855_v5 }
  0x39   : > { %477 = vst [vmem:[%s798_s25 + $0x108] sm:$0xff] %v413_v17  ;;  %478 = vst [vmem:[%s798_s25 + $0x110] sm:$0xff] %v414_v18  ;;  %v296_v36 = vmul.f32 %v627_v0, %v858_v2  ;;  %v297_v28 = vmul.f32 %v627_v0, %v861_v63  ;;  %v298_v59 = vmul.f32 %v627_v0, %v1157_v29  ;;  %v1160_v17 = vld [vmem:[#allocation5_spill] sm:$0xff] }
  0x3a   : > { %479 = vst [vmem:[%s798_s25 + $0x118] sm:$0xff] %v415_v27  ;;  %480 = vst [vmem:[%s798_s25 + $0x120] sm:$0xff] %v416_v24  ;;  %v427_v58 = vmax.f32 %v363_v39, 0.0  ;;  %v364_v7 = vadd.f32 %v639_v1, %v293_v10  ;;  %v365_v6 = vadd.f32 %v639_v1, %v294_v42  ;;  %v366_v5 = vadd.f32 %v639_v1, %v295_v35  ;;  %v1161_v24 = vld [vmem:[#allocation6_spill] sm:$0xff] }
  0x3b   : > { %481 = vst [vmem:[%s798_s25 + $0x128] sm:$0xff] %v417_v32  ;;  %482 = vst [vmem:[%s798_s25 + $0x130] sm:$0xff] %v418_v33  ;;  %v299_v54 = vmul.f32 %v627_v0, %v1158_v34  ;;  %v367_v2 = vadd.f32 %v639_v1, %v296_v36  ;;  %v368_v63 = vadd.f32 %v639_v1, %v297_v28 }
  0x3c   : > { %483 = vst [vmem:[%s798_s25 + $0x138] sm:$0xff] %v419_v44  ;;  %484 = vst [vmem:[%s798_s25 + $0x140] sm:$0xff] %v420_v57  ;;  %v369_v9 = vadd.f32 %v639_v1, %v298_v59  ;;  %v300_v46 = vmul.f32 %v627_v0, %v1159_v45  ;;  %v428_v47 = vmax.f32 %v364_v7, 0.0  ;;  %v429_v11 = vmax.f32 %v365_v6, 0.0  ;;  %v1164_v44 = vld [vmem:[#allocation9_spill] sm:$0xff] }
  0x3d   : > { %485 = vst [vmem:[%s798_s25 + $0x148] sm:$0xff] %v421_v3  ;;  %486 = vst [vmem:[%s798_s25 + $0x150] sm:$0xff] %v422_v8  ;;  %v430_v12 = vmax.f32 %v366_v5, 0.0  ;;  %v370_v13 = vadd.f32 %v639_v1, %v299_v54  ;;  %v431_v31 = vmax.f32 %v367_v2, 0.0  ;;  %v432_v15 = vmax.f32 %v368_v63, 0.0 }
  0x3e   : > { %487 = vst [vmem:[%s798_s25 + $0x158] sm:$0xff] %v423_v14  ;;  %488 = vst [vmem:[%s798_s25 + $0x160] sm:$0xff] %v424_v22  ;;  %v433_v19 = vmax.f32 %v369_v9, 0.0  ;;  %v371_v20 = vadd.f32 %v639_v1, %v300_v46  ;;  %v301_v16 = vmul.f32 %v627_v0, %v873_v37  ;;  %v302_v18 = vmul.f32 %v627_v0, %v1160_v17 }
  0x3f   : > { %489 = vst [vmem:[%s798_s25 + $0x168] sm:$0xff] %v425_v26  ;;  %490 = vst [vmem:[%s798_s25 + $0x170] sm:$0xff] %v426_v41  ;;  %v434_v30 = vmax.f32 %v370_v13, 0.0  ;;  %v303_v23 = vmul.f32 %v627_v0, %v883_v62  ;;  %v304_v32 = vmul.f32 %v627_v0, %v1161_v24  ;;  %v305_v33 = vmul.f32 %v627_v0, %v1162_v25 }
  0x40   : > { %491 = vst [vmem:[%s798_s25 + $0x178] sm:$0xff] %v427_v58  ;;  %492 = vst [vmem:[%s798_s25 + $0x180] sm:$0xff] %v428_v47  ;;  %v435_v27 = vmax.f32 %v371_v20, 0.0  ;;  %v306_v38 = vmul.f32 %v627_v0, %v1163_v43  ;;  %v372_v37 = vadd.f32 %v639_v1, %v301_v16  ;;  %v373_v40 = vadd.f32 %v639_v1, %v302_v18 }
  0x41   : > { %493 = vst [vmem:[%s798_s25 + $0x188] sm:$0xff] %v429_v11  ;;  %494 = vst [vmem:[%s798_s25 + $0x190] sm:$0xff] %v430_v12  ;;  %v374_v62 = vadd.f32 %v639_v1, %v303_v23  ;;  %v307_v48 = vmul.f32 %v627_v0, %v1164_v44  ;;  %v375_v49 = vadd.f32 %v639_v1, %v304_v32 }
  0x42   : > { %495 = vst [vmem:[%s798_s25 + $0x198] sm:$0xff] %v431_v31  ;;  %496 = vst [vmem:[%s798_s25 + $0x1a0] sm:$0xff] %v432_v15  ;;  %v376_v50 = vadd.f32 %v639_v1, %v305_v33  ;;  %v377_v4 = vadd.f32 %v639_v1, %v306_v38  ;;  %v308_v60 = vmul.f32 %v627_v0, %v1165_v61  ;;  %v436_v55 = vmax.f32 %v372_v37, 0.0 }
  0x43   : > { %497 = vst [vmem:[%s798_s25 + $0x1a8] sm:$0xff] %v433_v19  ;;  %498 = vst [vmem:[%s798_s25 + $0x1b0] sm:$0xff] %v434_v30  ;;  %v437_v53 = vmax.f32 %v373_v40, 0.0  ;;  %v438_v52 = vmax.f32 %v374_v62, 0.0  ;;  %v378_v51 = vadd.f32 %v639_v1, %v307_v48  ;;  %v439_v56 = vmax.f32 %v375_v49, 0.0 }
  0x44   : > { %499 = vst [vmem:[%s798_s25 + $0x1b8] sm:$0xff] %v435_v27  ;;  %v440_v57 = vmax.f32 %v376_v50, 0.0  ;;  %v441_v3 = vmax.f32 %v377_v4, 0.0  ;;  %v379_v8 = vadd.f32 %v639_v1, %v308_v60  ;;  %500 = vst [vmem:[%s798_s25 + $0x1c0] sm:$0xff] %v436_v55 }
  0x45   : > { %501 = vst [vmem:[%s798_s25 + $0x1c8] sm:$0xff] %v437_v53  ;;  %502 = vst [vmem:[%s798_s25 + $0x1d0] sm:$0xff] %v438_v52  ;;  %v442_v21 = vmax.f32 %v378_v51, 0.0 }
  0x46   : > { %503 = vst [vmem:[%s798_s25 + $0x1d8] sm:$0xff] %v439_v56  ;;  %504 = vst [vmem:[%s798_s25 + $0x1e0] sm:$0xff] %v440_v57  ;;  %v443_v0 = vmax.f32 %v379_v8, 0.0 }
  0x47   : > { %505 = vst [vmem:[%s798_s25 + $0x1e8] sm:$0xff] %v441_v3  ;;  %506 = vst [vmem:[%s798_s25 + $0x1f0] sm:$0xff] %v442_v21 }
  0x48   : > { %507 = vst [vmem:[%s798_s25 + $0x1f8] sm:$0xff] %v443_v0 }
  0x49 PF: > { %s13_s12 = sadd.s32 1, %s591_s12  }
  0x4a   : > { %p10_p4 = scmp.ge.s32.totalorder %s13_s12, 4  }
  0x4c   :  { %12 = sbr.rel (!%p10_p4) target bundleno = 1 (0x1), region = 62 }

// kernel: conv_block1.4
= control target key start
LH: loop header
LB: loop body
LE: loop exit
PB: predicated region body
PF: predicated region fallthrough
CT: control target
= control target key end

     0   :  { %s1349_s15 = smov 0   ;;  %s1756_s0 = inlined_call_operand.vmem [shape: f32[1024,128], index: 0, kind: input, shape index: {}]   ;;  %s1757_s1 = inlined_call_operand.vmem [shape: f32[128,128], index: 1, kind: input, shape index: {}]   ;;  %s1758_s2 = inlined_call_operand.vmem [shape: f32[1024,128], index: 2, kind: output, shape index: {0}]   ;;  %s1759_s3 = inlined_call_operand.vmem [shape: f32[2,1,128], index: 3, kind: output, shape index: {1}]   ;;  %s1760_s4 = inlined_call_operand.vmem [shape: f32[2,1,128], index: 4, kind: output, shape index: {2}]  }
   0x1 LB: > { %s1355_s16 = sadd.s32 4294967295, %s1322_s15   ;;  %p1061_p0 = scmp.ge.s32.totalorder %s1322_s15, 1  ;;  %s1322_s15 = sphi %s1349_s15, %s15_s15  }
   0x2   : > { %p168_p1 = scmp.lt.s32.totalorder %s1322_s15, 3 }
   0x4   : > { %p169_p2 = pnand %p1061_p0, %p168_p1 }
   0x5   : > { %s1062_s21 = sshll.u32 (!%p169_p2), %s1355_s16, 6  ;;  %p212_p4 = scmp.lt.s32.totalorder (!%p169_p2), %s1355_s16, 1 }
   0x6   : > { %172 = sbr.rel (%p169_p2) target bundleno = 382 (0x17e), region = 28  ;;  %p201_p3 = scmp.lt.s32.totalorder (!%p169_p2), %s1062_s21, 127 }
   0xb   : > { %v297_v0 = vld [vmem:[%s1757_s1 + $0x78] sm:$0xff]  ;;  %v296_v1 = vld [vmem:[%s1757_s1 + $0x70] sm:$0xff]  ;;  %v295_v2 = vld [vmem:[%s1757_s1 + $0x68] sm:$0xff]  ;;  %s1762_s21 = smov (!%p201_p3, %s1062_s21), 127  ;;  %s1764_s16 = smov (!%p212_p4, %s1355_s16), 1 }
   0xc   : > { %1148 = vmatprep.subr.mxu0 %v297_v0  ;;  %1276 = vmatprep.subr.mxu1 %v297_v0  ;;  %v294_v3 = vld [vmem:[%s1757_s1 + $0x60] sm:$0xff]  ;;  %s1063_s26 = sshll.u32 %s1762_s21, 3  ;;  %v293_v4 = vld [vmem:[%s1757_s1 + $0x58] sm:$0xff]  ;;  %v292_v6 = vld [vmem:[%s1757_s1 + $0x50] sm:$0xff]  ;;  %s217_s12 = scalar_lea.vmem %s1760_s4, %s1764_s16 }
   0xd   : > { %1149 = vmatpush3.msra.mxu0 %v297_v0  ;;  %1292 = vmatpush3.msra.mxu1 %v297_v0  ;;  %s1383_s5 = scalar_lea.vmem %s1756_s0, %s1063_s26  ;;  %v291_v7 = vld [vmem:[%s1757_s1 + $0x48] sm:$0xff]  ;;  %v290_v8 = vld [vmem:[%s1757_s1 + $0x40] sm:$0xff]  ;;  %v289_v9 = vld [vmem:[%s1757_s1 + $0x38] sm:$0xff]  ;;  %s1487_s9 = scalar_lea.vmem %s1758_s2, %s1063_s26 }
   0xe   : > { %1150 = vmatprep.subr.mxu0 %v296_v1  ;;  %1277 = vmatprep.subr.mxu1 %v296_v1  ;;  %v218_v5 = vld [vmem:[%s1383_s5] sm:$0xff]  ;;  %v288_v10 = vld [vmem:[%s1757_s1 + $0x30] sm:$0xff]  ;;  %v287_v11 = vld [vmem:[%s1757_s1 + $0x28] sm:$0xff] }
   0xf   : > { %1151 = vmatpush3.msra.mxu0 %v296_v1  ;;  %1293 = vmatpush3.msra.mxu1 %v296_v1  ;;  %v286_v12 = vld [vmem:[%s1757_s1 + $0x20] sm:$0xff]  ;;  %v285_v13 = vld [vmem:[%s1757_s1 + $0x18] sm:$0xff]  ;;  %v284_v14 = vld [vmem:[%s1757_s1 + $0x10] sm:$0xff] }
  0x10   : > { %1152 = vmatprep.subr.mxu0 %v295_v2  ;;  %1278 = vmatprep.subr.mxu1 %v295_v2  ;;  %v283_v15 = vld [vmem:[%s1757_s1 + $0x8] sm:$0xff]  ;;  %v282_v16 = vld [vmem:[%s1757_s1] sm:$0xff]  ;;  %v220_v18 = vld [vmem:[%s1383_s5 + $0x10] sm:$0xff] }
  0x11   : > { %1153 = vmatpush3.msra.mxu0 %v295_v2  ;;  %1294 = vmatpush3.msra.mxu1 %v295_v2  ;;  %v219_v17 = vld [vmem:[%s1383_s5 + $0x8] sm:$0xff]  ;;  %v250_v19 = vld [vmem:[%s1383_s5 + $0x100] sm:$0xff]  ;;  %v252_v21 = vld [vmem:[%s1383_s5 + $0x110] sm:$0xff] }
  0x12   : > { %1154 = vmatprep.subr.mxu0 %v294_v3  ;;  %1279 = vmatprep.subr.mxu1 %v294_v3  ;;  %v251_v20 = vld [vmem:[%s1383_s5 + $0x108] sm:$0xff]  ;;  %v221_v22 = vld [vmem:[%s1383_s5 + $0x18] sm:$0xff]  ;;  %v222_v23 = vld [vmem:[%s1383_s5 + $0x20] sm:$0xff] }
  0x13   : > { %1155 = vmatpush3.msra.mxu0 %v294_v3  ;;  %1180 = vmatprep.mubr.f32.mxu0 %v218_v5  ;;  %v253_v24 = vld [vmem:[%s1383_s5 + $0x118] sm:$0xff]  ;;  %v254_v25 = vld [vmem:[%s1383_s5 + $0x120] sm:$0xff]  ;;  %v223_v26 = vld [vmem:[%s1383_s5 + $0x28] sm:$0xff] }
  0x14   : > { %1156 = vmatprep.subr.mxu0 %v293_v4  ;;  %1295 = vmatpush3.msra.mxu1 %v294_v3  ;;  %v224_v27 = vld [vmem:[%s1383_s5 + $0x30] sm:$0xff]  ;;  %v255_v28 = vld [vmem:[%s1383_s5 + $0x128] sm:$0xff]  ;;  %v225_v30 = vld [vmem:[%s1383_s5 + $0x38] sm:$0xff] }
  0x15   : > { %1157 = vmatpush3.msra.mxu0 %v293_v4  ;;  %1280 = vmatprep.subr.mxu1 %v293_v4  ;;  %v256_v29 = vld [vmem:[%s1383_s5 + $0x130] sm:$0xff]  ;;  %v226_v31 = vld [vmem:[%s1383_s5 + $0x40] sm:$0xff]  ;;  %v257_v32 = vld [vmem:[%s1383_s5 + $0x138] sm:$0xff] }
  0x16   : > { %1158 = vmatprep.subr.mxu0 %v292_v6  ;;  %1296 = vmatpush3.msra.mxu1 %v293_v4  ;;  %v258_v33 = vld [vmem:[%s1383_s5 + $0x140] sm:$0xff]  ;;  %v227_v34 = vld [vmem:[%s1383_s5 + $0x48] sm:$0xff]  ;;  %v228_v35 = vld [vmem:[%s1383_s5 + $0x50] sm:$0xff] }
  0x17   : > { %1159 = vmatpush3.msra.mxu0 %v292_v6  ;;  %1281 = vmatprep.subr.mxu1 %v292_v6  ;;  %v259_v36 = vld [vmem:[%s1383_s5 + $0x148] sm:$0xff]  ;;  %v260_v37 = vld [vmem:[%s1383_s5 + $0x150] sm:$0xff]  ;;  %v229_v38 = vld [vmem:[%s1383_s5 + $0x58] sm:$0xff] }
  0x18   : > { %1160 = vmatprep.subr.mxu0 %v291_v7  ;;  %1297 = vmatpush3.msra.mxu1 %v292_v6  ;;  %v230_v39 = vld [vmem:[%s1383_s5 + $0x60] sm:$0xff]  ;;  %v261_v40 = vld [vmem:[%s1383_s5 + $0x158] sm:$0xff]  ;;  %v231_v42 = vld [vmem:[%s1383_s5 + $0x68] sm:$0xff] }
  0x19   : > { %1161 = vmatpush3.msra.mxu0 %v291_v7  ;;  %1282 = vmatprep.subr.mxu1 %v291_v7  ;;  %v262_v41 = vld [vmem:[%s1383_s5 + $0x160] sm:$0xff]  ;;  %v232_v43 = vld [vmem:[%s1383_s5 + $0x70] sm:$0xff]  ;;  %v263_v44 = vld [vmem:[%s1383_s5 + $0x168] sm:$0xff] }
  0x1a   : > { %1162 = vmatprep.subr.mxu0 %v290_v8  ;;  %1298 = vmatpush3.msra.mxu1 %v291_v7  ;;  %v264_v45 = vld [vmem:[%s1383_s5 + $0x170] sm:$0xff]  ;;  %v233_v46 = vld [vmem:[%s1383_s5 + $0x78] sm:$0xff]  ;;  %v234_v47 = vld [vmem:[%s1383_s5 + $0x80] sm:$0xff] }
  0x1b   : > { %1163 = vmatpush3.msra.mxu0 %v290_v8  ;;  %1283 = vmatprep.subr.mxu1 %v290_v8  ;;  %v265_v48 = vld [vmem:[%s1383_s5 + $0x178] sm:$0xff]  ;;  %v266_v49 = vld [vmem:[%s1383_s5 + $0x180] sm:$0xff]  ;;  %v235_v50 = vld [vmem:[%s1383_s5 + $0x88] sm:$0xff] }
  0x1c   : > { %1164 = vmatprep.subr.mxu0 %v289_v9  ;;  %1299 = vmatpush3.msra.mxu1 %v290_v8  ;;  %v236_v51 = vld [vmem:[%s1383_s5 + $0x90] sm:$0xff]  ;;  %v267_v52 = vld [vmem:[%s1383_s5 + $0x188] sm:$0xff]  ;;  %v237_v54 = vld [vmem:[%s1383_s5 + $0x98] sm:$0xff] }
  0x1d   : > { %1165 = vmatpush3.msra.mxu0 %v289_v9  ;;  %1284 = vmatprep.subr.mxu1 %v289_v9  ;;  %v268_v53 = vld [vmem:[%s1383_s5 + $0x190] sm:$0xff]  ;;  %v238_v55 = vld [vmem:[%s1383_s5 + $0xa0] sm:$0xff]  ;;  %v269_v56 = vld [vmem:[%s1383_s5 + $0x198] sm:$0xff] }
  0x1e   : > { %1166 = vmatprep.subr.mxu0 %v288_v10  ;;  %1300 = vmatpush3.msra.mxu1 %v289_v9  ;;  %v270_v57 = vld [vmem:[%s1383_s5 + $0x1a0] sm:$0xff]  ;;  %v239_v58 = vld [vmem:[%s1383_s5 + $0xa8] sm:$0xff]  ;;  %v240_v59 = vld [vmem:[%s1383_s5 + $0xb0] sm:$0xff] }
  0x1f   : > { %1167 = vmatpush3.msra.mxu0 %v288_v10  ;;  %1285 = vmatprep.subr.mxu1 %v288_v10  ;;  %v271_v60 = vld [vmem:[%s1383_s5 + $0x1a8] sm:$0xff]  ;;  %v272_v61 = vld [vmem:[%s1383_s5 + $0x1b0] sm:$0xff]  ;;  %v241_v62 = vld [vmem:[%s1383_s5 + $0xb8] sm:$0xff] }
  0x20   : > { %1168 = vmatprep.subr.mxu0 %v287_v11  ;;  %1301 = vmatpush3.msra.mxu1 %v288_v10  ;;  %v242_v63 = vld [vmem:[%s1383_s5 + $0xc0] sm:$0xff]  ;;  %v273_v0 = vld [vmem:[%s1383_s5 + $0x1b8] sm:$0xff]  ;;  %v243_v2 = vld [vmem:[%s1383_s5 + $0xc8] sm:$0xff] }
  0x21   : > { %1169 = vmatpush3.msra.mxu0 %v287_v11  ;;  %1286 = vmatprep.subr.mxu1 %v287_v11  ;;  %v274_v1 = vld [vmem:[%s1383_s5 + $0x1c0] sm:$0xff]  ;;  %v244_v3 = vld [vmem:[%s1383_s5 + $0xd0] sm:$0xff]  ;;  %v275_v4 = vld [vmem:[%s1383_s5 + $0x1c8] sm:$0xff] }
  0x22   : > { %1170 = vmatprep.subr.mxu0 %v286_v12  ;;  %1302 = vmatpush3.msra.mxu1 %v287_v11  ;;  %v276_v5 = vld [vmem:[%s1383_s5 + $0x1d0] sm:$0xff]  ;;  %v245_v6 = vld [vmem:[%s1383_s5 + $0xd8] sm:$0xff]  ;;  %v246_v7 = vld [vmem:[%s1383_s5 + $0xe0] sm:$0xff] }
  0x23   : > { %1171 = vmatpush3.msra.mxu0 %v286_v12  ;;  %1287 = vmatprep.subr.mxu1 %v286_v12  ;;  %v277_v8 = vld [vmem:[%s1383_s5 + $0x1d8] sm:$0xff]  ;;  %v278_v9 = vld [vmem:[%s1383_s5 + $0x1e0] sm:$0xff]  ;;  %v247_v10 = vld [vmem:[%s1383_s5 + $0xe8] sm:$0xff] }
  0x24   : > { %1172 = vmatprep.subr.mxu0 %v285_v13  ;;  %1303 = vmatpush3.msra.mxu1 %v286_v12  ;;  %v248_v11 = vld [vmem:[%s1383_s5 + $0xf0] sm:$0xff]  ;;  %v279_v12 = vld [vmem:[%s1383_s5 + $0x1e8] sm:$0xff] }
  0x25   : > { %1173 = vmatpush3.msra.mxu0 %v285_v13  ;;  %1288 = vmatprep.subr.mxu1 %v285_v13 }
  0x26   : > { %1174 = vmatprep.subr.mxu0 %v284_v14  ;;  %1304 = vmatpush3.msra.mxu1 %v285_v13  ;;  %v280_v13 = vld [vmem:[%s1383_s5 + $0x1f0] sm:$0xff] }
  0x27   : > { %1175 = vmatpush3.msra.mxu0 %v284_v14  ;;  %1289 = vmatprep.subr.mxu1 %v284_v14 }
  0x28   : > { %1176 = vmatprep.subr.mxu0 %v283_v15  ;;  %1305 = vmatpush3.msra.mxu1 %v284_v14  ;;  %v249_v14 = vld [vmem:[%s1383_s5 + $0xf8] sm:$0xff] }
  0x29   : > { %1177 = vmatpush3.msra.mxu0 %v283_v15  ;;  %1290 = vmatprep.subr.mxu1 %v283_v15 }
  0x2a   : > { %1178 = vmatprep.subr.mxu0 %v282_v16  ;;  %1306 = vmatpush3.msra.mxu1 %v283_v15  ;;  %v281_v15 = vld [vmem:[%s1383_s5 + $0x1f8] sm:$0xff]  ;;  %s214_s5 = scalar_lea.vmem %s1759_s3, %s1764_s16 }
  0x2b   : > { %1179 = vmatpush3.msra.mxu0 %v282_v16  ;;  %1291 = vmatprep.subr.mxu1 %v282_v16 }
  0x2c   : > { %1181 = vmatmul.mubr.f32.vlgmr.msra.gmra.mxu0 %v219_v17  ;;  %1307 = vmatpush3.msra.mxu1 %v282_v16 }
  0x2d   : > { %1183 = vmatprep.mubr.f32.mxu0 %v220_v18  ;;  %1228 = vmatprep.mubr.f32.mxu1 %v250_v19 }
  0x2e   : > { %1229 = vmatmul.mubr.f32.vlgmr.msra.gmra.mxu1 %v251_v20 }
  0x2f   : > { %1231 = vmatprep.mubr.f32.mxu1 %v252_v21 }
  0x30   : > { %1184 = vmatmul.mubr.f32.gmra.mxu0 %v221_v22 }
  0x31   : > { %1186 = vmatprep.mubr.f32.mxu0 %v222_v23 }
  0x32   : > { %1232 = vmatmul.mubr.f32.gmra.mxu1 %v253_v24 }
  0x33   : > { %1234 = vmatprep.mubr.f32.mxu1 %v254_v25 }
  0x34   : > { %1187 = vmatmul.mubr.f32.gmra.mxu0 %v223_v26 }
  0x35   : > { %1189 = vmatprep.mubr.f32.mxu0 %v224_v27 }
  0x36   : > { %1235 = vmatmul.mubr.f32.gmra.mxu1 %v255_v28 }
  0x37   : > { %1237 = vmatprep.mubr.f32.mxu1 %v256_v29 }
  0x38   : > { %1190 = vmatmul.mubr.f32.gmra.mxu0 %v225_v30 }
  0x39   : > { %1192 = vmatprep.mubr.f32.mxu0 %v226_v31 }
  0x3a   : > { %1238 = vmatmul.mubr.f32.gmra.mxu1 %v257_v32 }
  0x3b   : > { %1240 = vmatprep.mubr.f32.mxu1 %v258_v33 }
  0x3c   : > { %1193 = vmatmul.mubr.f32.gmra.mxu0 %v227_v34 }
  0x3d   : > { %1195 = vmatprep.mubr.f32.mxu0 %v228_v35 }
  0x3e   : > { %1241 = vmatmul.mubr.f32.gmra.mxu1 %v259_v36 }
  0x3f   : > { %1243 = vmatprep.mubr.f32.mxu1 %v260_v37 }
  0x40   : > { %1196 = vmatmul.mubr.f32.gmra.mxu0 %v229_v38 }
  0x41   : > { %1198 = vmatprep.mubr.f32.mxu0 %v230_v39 }
  0x42   : > { %1244 = vmatmul.mubr.f32.gmra.mxu1 %v261_v40 }
  0x43   : > { %1246 = vmatprep.mubr.f32.mxu1 %v262_v41 }
  0x44   : > { %1199 = vmatmul.mubr.f32.gmra.mxu0 %v231_v42 }
  0x45   : > { %1201 = vmatprep.mubr.f32.mxu0 %v232_v43 }
  0x46   : > { %1247 = vmatmul.mubr.f32.gmra.mxu1 %v263_v44 }
  0x47   : > { %1249 = vmatprep.mubr.f32.mxu1 %v264_v45 }
  0x48   : > { %1202 = vmatmul.mubr.f32.gmra.mxu0 %v233_v46 }
  0x49   : > { %1204 = vmatprep.mubr.f32.mxu0 %v234_v47 }
  0x4a   : > { %1250 = vmatmul.mubr.f32.gmra.mxu1 %v265_v48 }
  0x4b   : > { %1252 = vmatprep.mubr.f32.mxu1 %v266_v49 }
  0x4c   : > { %1205 = vmatmul.mubr.f32.gmra.mxu0 %v235_v50 }
  0x4d   : > { %1207 = vmatprep.mubr.f32.mxu0 %v236_v51 }
  0x4e   : > { %1253 = vmatmul.mubr.f32.gmra.mxu1 %v267_v52 }
  0x4f   : > { %1255 = vmatprep.mubr.f32.mxu1 %v268_v53 }
  0x50   : > { %1208 = vmatmul.mubr.f32.gmra.mxu0 %v237_v54 }
  0x51   : > { %1210 = vmatprep.mubr.f32.mxu0 %v238_v55 }
  0x52   : > { %1256 = vmatmul.mubr.f32.gmra.mxu1 %v269_v56 }
  0x53   : > { %1258 = vmatprep.mubr.f32.mxu1 %v270_v57 }
  0x54   : > { %1211 = vmatmul.mubr.f32.gmra.mxu0 %v239_v58 }
  0x55   : > { %1213 = vmatprep.mubr.f32.mxu0 %v240_v59 }
  0x56   : > { %1259 = vmatmul.mubr.f32.gmra.mxu1 %v271_v60 }
  0x57   : > { %1261 = vmatprep.mubr.f32.mxu1 %v272_v61 }
  0x58   : > { %1214 = vmatmul.mubr.f32.gmra.mxu0 %v241_v62 }
  0x59   : > { %1216 = vmatprep.mubr.f32.mxu0 %v242_v63 }
  0x5a   : > { %1262 = vmatmul.mubr.f32.gmra.mxu1 %v273_v0 }
  0x5b   : > { %1264 = vmatprep.mubr.f32.mxu1 %v274_v1 }
  0x5c   : > { %1217 = vmatmul.mubr.f32.gmra.mxu0 %v243_v2 }
  0x5d   : > { %1219 = vmatprep.mubr.f32.mxu0 %v244_v3 }
  0x5e   : > { %1265 = vmatmul.mubr.f32.gmra.mxu1 %v275_v4 }
  0x5f   : > { %1267 = vmatprep.mubr.f32.mxu1 %v276_v5 }
  0x60   : > { %1220 = vmatmul.mubr.f32.gmra.mxu0 %v245_v6 }
  0x61   : > { %1222 = vmatprep.mubr.f32.mxu0 %v246_v7 }
  0x62   : > { %1268 = vmatmul.mubr.f32.gmra.mxu1 %v277_v8 }
  0x63   : > { %1270 = vmatprep.mubr.f32.mxu1 %v278_v9 }
  0x64   : > { %1223 = vmatmul.mubr.f32.gmra.mxu0 %v247_v10 }
  0x65   : > { %1225 = vmatprep.mubr.f32.mxu0 %v248_v11 }
  0x66   : > { %1271 = vmatmul.mubr.f32.gmra.mxu1 %v279_v12 }
  0x67   : > { %1273 = vmatprep.mubr.f32.mxu1 %v280_v13 }
  0x68   : > { %1226 = vmatmul.mubr.f32.gmra.mxu0 %v249_v14 }
  0x6a   : > { %1274 = vmatmul.mubr.f32.gmra.mxu1 %v281_v15 }
  0xec   : > { %v1182_v16 = vpop.f32.mrf.mxu0 }
  0xed   : > { %684 = vst [vmem:[%s1487_s9 + $0x8] sm:$0xff] %v1182_v16  ;;  %v817_v22 = vmul.f32 %v1182_v16, %v1182_v16 }
  0xee   : > { %v364_v17 = vpop.f32.mrf.mxu0  ;;  %v1490_v18 = vpop.f32.mrf.mxu1 }
  0xef   : > { %683 = vst [vmem:[%s1487_s9] sm:$0xff] %v364_v17  ;;  %v816_v19 = vmul.f32 %v364_v17, %v364_v17  ;;  %716 = vst [vmem:[%s1487_s9 + $0x108] sm:$0xff] %v1490_v18  ;;  %v747_v23 = vadd.f32 %v1182_v16, %v364_v17 }
  0xf0   : > { %v1185_v20 = vpop.f32.mrf.mxu0  ;;  %v1495_v21 = vpop.f32.mrf.mxu1 }
  0xf1   : > { %686 = vst [vmem:[%s1487_s9 + $0x18] sm:$0xff] %v1185_v20  ;;  %715 = vst [vmem:[%s1487_s9 + $0x100] sm:$0xff] %v1495_v21  ;;  %v880_v26 = vadd.f32 %v817_v22, %v816_v19  ;;  %v819_v31 = vmul.f32 %v1185_v20, %v1185_v20 }
  0xf2   : > { %v374_v24 = vpop.f32.mrf.mxu0  ;;  %v1500_v25 = vpop.f32.mrf.mxu1 }
  0xf3   : > { %685 = vst [vmem:[%s1487_s9 + $0x10] sm:$0xff] %v374_v24  ;;  %v748_v27 = vadd.f32 %v747_v23, %v374_v24  ;;  %v818_v28 = vmul.f32 %v374_v24, %v374_v24  ;;  %718 = vst [vmem:[%s1487_s9 + $0x118] sm:$0xff] %v1500_v25 }
  0xf4   : > { %v1188_v29 = vpop.f32.mrf.mxu0  ;;  %v1505_v30 = vpop.f32.mrf.mxu1 }
  0xf5   : > { %v881_v32 = vadd.f32 %v880_v26, %v818_v28  ;;  %688 = vst [vmem:[%s1487_s9 + $0x28] sm:$0xff] %v1188_v29  ;;  %v749_v33 = vadd.f32 %v1185_v20, %v748_v27  ;;  %717 = vst [vmem:[%s1487_s9 + $0x110] sm:$0xff] %v1505_v30  ;;  %v821_v41 = vmul.f32 %v1188_v29, %v1188_v29 }
  0xf6   : > { %v384_v34 = vpop.f32.mrf.mxu0  ;;  %v1510_v35 = vpop.f32.mrf.mxu1 }
  0xf7   : > { %687 = vst [vmem:[%s1487_s9 + $0x20] sm:$0xff] %v384_v34  ;;  %v750_v36 = vadd.f32 %v749_v33, %v384_v34  ;;  %v820_v37 = vmul.f32 %v384_v34, %v384_v34  ;;  %v882_v38 = vadd.f32 %v881_v32, %v819_v31  ;;  %720 = vst [vmem:[%s1487_s9 + $0x128] sm:$0xff] %v1510_v35 }
  0xf8   : > { %v1191_v39 = vpop.f32.mrf.mxu0  ;;  %v1515_v40 = vpop.f32.mrf.mxu1 }
  0xf9   : > { %v883_v42 = vadd.f32 %v882_v38, %v820_v37  ;;  %690 = vst [vmem:[%s1487_s9 + $0x38] sm:$0xff] %v1191_v39  ;;  %v751_v43 = vadd.f32 %v1188_v29, %v750_v36  ;;  %719 = vst [vmem:[%s1487_s9 + $0x120] sm:$0xff] %v1515_v40  ;;  %v823_v51 = vmul.f32 %v1191_v39, %v1191_v39 }
  0xfa   : > { %v394_v44 = vpop.f32.mrf.mxu0  ;;  %v1520_v45 = vpop.f32.mrf.mxu1 }
  0xfb   : > { %689 = vst [vmem:[%s1487_s9 + $0x30] sm:$0xff] %v394_v44  ;;  %v752_v46 = vadd.f32 %v751_v43, %v394_v44  ;;  %v822_v47 = vmul.f32 %v394_v44, %v394_v44  ;;  %v884_v48 = vadd.f32 %v883_v42, %v821_v41  ;;  %722 = vst [vmem:[%s1487_s9 + $0x138] sm:$0xff] %v1520_v45 }
  0xfc   : > { %v1194_v49 = vpop.f32.mrf.mxu0  ;;  %v1525_v50 = vpop.f32.mrf.mxu1 }
  0xfd   : > { %v885_v52 = vadd.f32 %v884_v48, %v822_v47  ;;  %692 = vst [vmem:[%s1487_s9 + $0x48] sm:$0xff] %v1194_v49  ;;  %v753_v53 = vadd.f32 %v1191_v39, %v752_v46  ;;  %721 = vst [vmem:[%s1487_s9 + $0x130] sm:$0xff] %v1525_v50  ;;  %v825_v61 = vmul.f32 %v1194_v49, %v1194_v49 }
  0xfe   : > { %v404_v54 = vpop.f32.mrf.mxu0  ;;  %v1530_v55 = vpop.f32.mrf.mxu1 }
  0xff   : > { %691 = vst [vmem:[%s1487_s9 + $0x40] sm:$0xff] %v404_v54  ;;  %v754_v56 = vadd.f32 %v753_v53, %v404_v54  ;;  %v824_v57 = vmul.f32 %v404_v54, %v404_v54  ;;  %v886_v58 = vadd.f32 %v885_v52, %v823_v51  ;;  %724 = vst [vmem:[%s1487_s9 + $0x148] sm:$0xff] %v1530_v55 }
 0x100   : > { %v1197_v59 = vpop.f32.mrf.mxu0  ;;  %v1535_v60 = vpop.f32.mrf.mxu1 }
 0x101   : > { %v887_v62 = vadd.f32 %v886_v58, %v824_v57  ;;  %694 = vst [vmem:[%s1487_s9 + $0x58] sm:$0xff] %v1197_v59  ;;  %v755_v63 = vadd.f32 %v1194_v49, %v754_v56  ;;  %723 = vst [vmem:[%s1487_s9 + $0x140] sm:$0xff] %v1535_v60  ;;  %v827_v7 = vmul.f32 %v1197_v59, %v1197_v59 }
 0x102   : > { %v414_v0 = vpop.f32.mrf.mxu0  ;;  %v1540_v1 = vpop.f32.mrf.mxu1 }
 0x103   : > { %693 = vst [vmem:[%s1487_s9 + $0x50] sm:$0xff] %v414_v0  ;;  %v756_v2 = vadd.f32 %v755_v63, %v414_v0  ;;  %v826_v3 = vmul.f32 %v414_v0, %v414_v0  ;;  %v888_v4 = vadd.f32 %v887_v62, %v825_v61  ;;  %726 = vst [vmem:[%s1487_s9 + $0x158] sm:$0xff] %v1540_v1 }
 0x104   : > { %v1200_v5 = vpop.f32.mrf.mxu0  ;;  %v1545_v6 = vpop.f32.mrf.mxu1 }
 0x105   : > { %v889_v8 = vadd.f32 %v888_v4, %v826_v3  ;;  %696 = vst [vmem:[%s1487_s9 + $0x68] sm:$0xff] %v1200_v5  ;;  %v757_v9 = vadd.f32 %v1197_v59, %v756_v2  ;;  %725 = vst [vmem:[%s1487_s9 + $0x150] sm:$0xff] %v1545_v6  ;;  %v829_v17 = vmul.f32 %v1200_v5, %v1200_v5 }
 0x106   : > { %v424_v10 = vpop.f32.mrf.mxu0  ;;  %v1550_v11 = vpop.f32.mrf.mxu1 }
 0x107   : > { %695 = vst [vmem:[%s1487_s9 + $0x60] sm:$0xff] %v424_v10  ;;  %v758_v12 = vadd.f32 %v757_v9, %v424_v10  ;;  %v828_v13 = vmul.f32 %v424_v10, %v424_v10  ;;  %v890_v14 = vadd.f32 %v889_v8, %v827_v7  ;;  %728 = vst [vmem:[%s1487_s9 + $0x168] sm:$0xff] %v1550_v11 }
 0x108   : > { %v1203_v15 = vpop.f32.mrf.mxu0  ;;  %v1555_v16 = vpop.f32.mrf.mxu1 }
 0x109   : > { %v891_v19 = vadd.f32 %v890_v14, %v828_v13  ;;  %698 = vst [vmem:[%s1487_s9 + $0x78] sm:$0xff] %v1203_v15  ;;  %v759_v20 = vadd.f32 %v1200_v5, %v758_v12  ;;  %727 = vst [vmem:[%s1487_s9 + $0x160] sm:$0xff] %v1555_v16  ;;  %v831_v31 = vmul.f32 %v1203_v15, %v1203_v15 }
 0x10a   : > { %v434_v22 = vpop.f32.mrf.mxu0  ;;  %v1560_v23 = vpop.f32.mrf.mxu1 }
 0x10b   : > { %697 = vst [vmem:[%s1487_s9 + $0x70] sm:$0xff] %v434_v22  ;;  %v760_v24 = vadd.f32 %v759_v20, %v434_v22  ;;  %v830_v26 = vmul.f32 %v434_v22, %v434_v22  ;;  %v892_v27 = vadd.f32 %v891_v19, %v829_v17  ;;  %730 = vst [vmem:[%s1487_s9 + $0x178] sm:$0xff] %v1560_v23 }
 0x10c   : > { %v1206_v28 = vpop.f32.mrf.mxu0  ;;  %v1565_v29 = vpop.f32.mrf.mxu1 }
 0x10d   : > { %v893_v32 = vadd.f32 %v892_v27, %v830_v26  ;;  %700 = vst [vmem:[%s1487_s9 + $0x88] sm:$0xff] %v1206_v28  ;;  %v761_v33 = vadd.f32 %v1203_v15, %v760_v24  ;;  %729 = vst [vmem:[%s1487_s9 + $0x170] sm:$0xff] %v1565_v29  ;;  %v833_v43 = vmul.f32 %v1206_v28, %v1206_v28 }
 0x10e   : > { %v444_v34 = vpop.f32.mrf.mxu0  ;;  %v1570_v36 = vpop.f32.mrf.mxu1 }
 0x10f   : > { %699 = vst [vmem:[%s1487_s9 + $0x80] sm:$0xff] %v444_v34  ;;  %v762_v37 = vadd.f32 %v761_v33, %v444_v34  ;;  %v832_v38 = vmul.f32 %v444_v34, %v444_v34  ;;  %v894_v39 = vadd.f32 %v893_v32, %v831_v31  ;;  %732 = vst [vmem:[%s1487_s9 + $0x188] sm:$0xff] %v1570_v36 }
 0x110   : > { %v1209_v41 = vpop.f32.mrf.mxu0  ;;  %v1575_v42 = vpop.f32.mrf.mxu1 }
 0x111   : > { %v895_v44 = vadd.f32 %v894_v39, %v832_v38  ;;  %702 = vst [vmem:[%s1487_s9 + $0x98] sm:$0xff] %v1209_v41  ;;  %v763_v46 = vadd.f32 %v1206_v28, %v762_v37  ;;  %731 = vst [vmem:[%s1487_s9 + $0x180] sm:$0xff] %v1575_v42  ;;  %v835_v56 = vmul.f32 %v1209_v41, %v1209_v41 }
 0x112   : > { %v454_v47 = vpop.f32.mrf.mxu0  ;;  %v1580_v48 = vpop.f32.mrf.mxu1 }
 0x113   : > { %701 = vst [vmem:[%s1487_s9 + $0x90] sm:$0xff] %v454_v47  ;;  %v764_v49 = vadd.f32 %v763_v46, %v454_v47  ;;  %v834_v51 = vmul.f32 %v454_v47, %v454_v47  ;;  %v896_v52 = vadd.f32 %v895_v44, %v833_v43  ;;  %734 = vst [vmem:[%s1487_s9 + $0x198] sm:$0xff] %v1580_v48 }
 0x114   : > { %v1212_v53 = vpop.f32.mrf.mxu0  ;;  %v1585_v54 = vpop.f32.mrf.mxu1 }
 0x115   : > { %v897_v57 = vadd.f32 %v896_v52, %v834_v51  ;;  %704 = vst [vmem:[%s1487_s9 + $0xa8] sm:$0xff] %v1212_v53  ;;  %v765_v58 = vadd.f32 %v1209_v41, %v764_v49  ;;  %733 = vst [vmem:[%s1487_s9 + $0x190] sm:$0xff] %v1585_v54  ;;  %v837_v4 = vmul.f32 %v1212_v53, %v1212_v53 }
 0x116   : > { %v464_v59 = vpop.f32.mrf.mxu0  ;;  %v1590_v61 = vpop.f32.mrf.mxu1 }
 0x117   : > { %703 = vst [vmem:[%s1487_s9 + $0xa0] sm:$0xff] %v464_v59  ;;  %v766_v62 = vadd.f32 %v765_v58, %v464_v59  ;;  %v836_v63 = vmul.f32 %v464_v59, %v464_v59  ;;  %v898_v0 = vadd.f32 %v897_v57, %v835_v56  ;;  %736 = vst [vmem:[%s1487_s9 + $0x1a8] sm:$0xff] %v1590_v61 }
 0x118   : > { %v1215_v2 = vpop.f32.mrf.mxu0  ;;  %v1595_v3 = vpop.f32.mrf.mxu1 }
 0x119   : > { %v899_v5 = vadd.f32 %v898_v0, %v836_v63  ;;  %706 = vst [vmem:[%s1487_s9 + $0xb8] sm:$0xff] %v1215_v2  ;;  %v767_v7 = vadd.f32 %v1212_v53, %v766_v62  ;;  %735 = vst [vmem:[%s1487_s9 + $0x1a0] sm:$0xff] %v1595_v3  ;;  %v839_v17 = vmul.f32 %v1215_v2, %v1215_v2 }
 0x11a   : > { %v474_v8 = vpop.f32.mrf.mxu0  ;;  %v1600_v9 = vpop.f32.mrf.mxu1 }
 0x11b   : > { %705 = vst [vmem:[%s1487_s9 + $0xb0] sm:$0xff] %v474_v8  ;;  %v768_v10 = vadd.f32 %v767_v7, %v474_v8  ;;  %v838_v12 = vmul.f32 %v474_v8, %v474_v8  ;;  %v900_v13 = vadd.f32 %v899_v5, %v837_v4  ;;  %738 = vst [vmem:[%s1487_s9 + $0x1b8] sm:$0xff] %v1600_v9 }
 0x11c   : > { %v1218_v14 = vpop.f32.mrf.mxu0  ;;  %v1605_v15 = vpop.f32.mrf.mxu1 }
 0x11d   : > { %v901_v19 = vadd.f32 %v900_v13, %v838_v12  ;;  %708 = vst [vmem:[%s1487_s9 + $0xc8] sm:$0xff] %v1218_v14  ;;  %v769_v20 = vadd.f32 %v1215_v2, %v768_v10  ;;  %737 = vst [vmem:[%s1487_s9 + $0x1b0] sm:$0xff] %v1605_v15  ;;  %v841_v33 = vmul.f32 %v1218_v14, %v1218_v14 }
 0x11e   : > { %v484_v22 = vpop.f32.mrf.mxu0  ;;  %v1610_v24 = vpop.f32.mrf.mxu1 }
 0x11f   : > { %707 = vst [vmem:[%s1487_s9 + $0xc0] sm:$0xff] %v484_v22  ;;  %v770_v26 = vadd.f32 %v769_v20, %v484_v22  ;;  %v840_v27 = vmul.f32 %v484_v22, %v484_v22  ;;  %v902_v28 = vadd.f32 %v901_v19, %v839_v17  ;;  %740 = vst [vmem:[%s1487_s9 + $0x1c8] sm:$0xff] %v1610_v24 }
 0x120   : > { %v1221_v31 = vpop.f32.mrf.mxu0  ;;  %v1615_v32 = vpop.f32.mrf.mxu1 }
 0x121   : > { %v903_v34 = vadd.f32 %v902_v28, %v840_v27  ;;  %710 = vst [vmem:[%s1487_s9 + $0xd8] sm:$0xff] %v1221_v31  ;;  %v771_v37 = vadd.f32 %v1218_v14, %v770_v26  ;;  %739 = vst [vmem:[%s1487_s9 + $0x1c0] sm:$0xff] %v1615_v32  ;;  %v843_v49 = vmul.f32 %v1221_v31, %v1221_v31 }
 0x122   : > { %v494_v38 = vpop.f32.mrf.mxu0  ;;  %v1620_v39 = vpop.f32.mrf.mxu1  ;;  %v848_v26 = vmul.f32 %v1495_v21, %v1495_v21  ;;  %v849_v27 = vmul.f32 %v1490_v18, %v1490_v18 }
 0x123   : > { %709 = vst [vmem:[%s1487_s9 + $0xd0] sm:$0xff] %v494_v38  ;;  %v772_v41 = vadd.f32 %v771_v37, %v494_v38  ;;  %v842_v43 = vmul.f32 %v494_v38, %v494_v38  ;;  %v904_v44 = vadd.f32 %v903_v34, %v841_v33  ;;  %742 = vst [vmem:[%s1487_s9 + $0x1d8] sm:$0xff] %v1620_v39 }
 0x124   : > { %v1224_v46 = vpop.f32.mrf.mxu0  ;;  %v1625_v47 = vpop.f32.mrf.mxu1  ;;  %v850_v34 = vmul.f32 %v1505_v30, %v1505_v30  ;;  %v851_v38 = vmul.f32 %v1500_v25, %v1500_v25 }
 0x125   : > { %v905_v51 = vadd.f32 %v904_v44, %v842_v43  ;;  %712 = vst [vmem:[%s1487_s9 + $0xe8] sm:$0xff] %v1224_v46  ;;  %v773_v52 = vadd.f32 %v1221_v31, %v772_v41  ;;  %741 = vst [vmem:[%s1487_s9 + $0x1d0] sm:$0xff] %v1625_v47  ;;  %v845_v0 = vmul.f32 %v1224_v46, %v1224_v46 }
 0x126   : > { %v504_v53 = vpop.f32.mrf.mxu0  ;;  %v1630_v56 = vpop.f32.mrf.mxu1  ;;  %v852_v44 = vmul.f32 %v1515_v40, %v1515_v40 }
 0x127   : > { %711 = vst [vmem:[%s1487_s9 + $0xe0] sm:$0xff] %v504_v53  ;;  %v774_v57 = vadd.f32 %v773_v52, %v504_v53  ;;  %v844_v58 = vmul.f32 %v504_v53, %v504_v53  ;;  %v906_v59 = vadd.f32 %v905_v51, %v843_v49  ;;  %744 = vst [vmem:[%s1487_s9 + $0x1e8] sm:$0xff] %v1630_v56 }
 0x128   : > { %v1227_v62 = vpop.f32.mrf.mxu0  ;;  %v1635_v63 = vpop.f32.mrf.mxu1  ;;  %v854_v52 = vmul.f32 %v1525_v50, %v1525_v50 }
 0x129   : > { %v907_v2 = vadd.f32 %v906_v59, %v844_v58  ;;  %714 = vst [vmem:[%s1487_s9 + $0xf8] sm:$0xff] %v1227_v62  ;;  %v775_v4 = vadd.f32 %v1224_v46, %v774_v57  ;;  %743 = vst [vmem:[%s1487_s9 + $0x1e0] sm:$0xff] %v1635_v63  ;;  %v847_v14 = vmul.f32 %v1227_v62, %v1227_v62 }
 0x12a   : > { %v514_v5 = vpop.f32.mrf.mxu0  ;;  %v1640_v7 = vpop.f32.mrf.mxu1  ;;  %v856_v59 = vmul.f32 %v1535_v60, %v1535_v60 }
 0x12b   : > { %713 = vst [vmem:[%s1487_s9 + $0xf0] sm:$0xff] %v514_v5  ;;  %v776_v8 = vadd.f32 %v775_v4, %v514_v5  ;;  %v846_v10 = vmul.f32 %v514_v5, %v514_v5  ;;  %v908_v12 = vadd.f32 %v907_v2, %v845_v0  ;;  %746 = vst [vmem:[%s1487_s9 + $0x1f8] sm:$0xff] %v1640_v7 }
 0x12c   : > { %v1645_v13 = vpop.f32.mrf.mxu1  ;;  %v858_v4 = vmul.f32 %v1545_v6, %v1545_v6 }
 0x12d   : > { %v777_v17 = vadd.f32 %v1227_v62, %v776_v8  ;;  %v909_v19 = vadd.f32 %v908_v12, %v846_v10  ;;  %745 = vst [vmem:[%s1487_s9 + $0x1f0] sm:$0xff] %v1645_v13  ;;  %v860_v12 = vmul.f32 %v1555_v16, %v1555_v16 }
 0x12f   : > { %v910_v20 = vadd.f32 %v909_v19, %v847_v14  ;;  %v778_v22 = vadd.f32 %v777_v17, %v1495_v21 }
 0x131   : > { %v911_v28 = vadd.f32 %v910_v20, %v848_v26  ;;  %v779_v31 = vadd.f32 %v1490_v18, %v778_v22  ;;  %v853_v18 = vmul.f32 %v1510_v35, %v1510_v35  ;;  %v862_v20 = vmul.f32 %v1565_v29, %v1565_v29 }
 0x133   : > { %v780_v33 = vadd.f32 %v779_v31, %v1505_v30  ;;  %v912_v37 = vadd.f32 %v911_v28, %v849_v27  ;;  %v864_v28 = vmul.f32 %v1575_v42, %v1575_v42 }
 0x135   : > { %v913_v41 = vadd.f32 %v912_v37, %v850_v34  ;;  %v781_v43 = vadd.f32 %v1500_v25, %v780_v33  ;;  %v855_v25 = vmul.f32 %v1520_v45, %v1520_v45  ;;  %v866_v37 = vmul.f32 %v1585_v54, %v1585_v54 }
 0x137   : > { %v782_v21 = vadd.f32 %v781_v43, %v1515_v40  ;;  %v914_v46 = vadd.f32 %v913_v41, %v851_v38 }
 0x139   : > { %v915_v49 = vadd.f32 %v914_v46, %v852_v44  ;;  %v783_v51 = vadd.f32 %v1510_v35, %v782_v21  ;;  %v857_v35 = vmul.f32 %v1530_v55, %v1530_v55  ;;  %v868_v21 = vmul.f32 %v1595_v3, %v1595_v3 }
 0x13b   : > { %v784_v30 = vadd.f32 %v783_v51, %v1525_v50  ;;  %v916_v53 = vadd.f32 %v915_v49, %v853_v18  ;;  %v870_v49 = vmul.f32 %v1605_v15, %v1605_v15 }
 0x13d   : > { %v917_v57 = vadd.f32 %v916_v53, %v854_v52  ;;  %v785_v58 = vadd.f32 %v1520_v45, %v784_v30  ;;  %v859_v45 = vmul.f32 %v1540_v1, %v1540_v1  ;;  %v872_v53 = vmul.f32 %v1615_v32, %v1615_v32 }
 0x13f   : > { %v786_v40 = vadd.f32 %v785_v58, %v1535_v60  ;;  %v918_v62 = vadd.f32 %v917_v57, %v855_v25 }
 0x141   : > { %v919_v0 = vadd.f32 %v918_v62, %v856_v59  ;;  %v787_v2 = vadd.f32 %v1530_v55, %v786_v40  ;;  %v861_v55 = vmul.f32 %v1550_v11, %v1550_v11  ;;  %v874_v40 = vmul.f32 %v1625_v47, %v1625_v47 }
 0x143   : > { %v788_v50 = vadd.f32 %v787_v2, %v1545_v6  ;;  %v920_v5 = vadd.f32 %v919_v0, %v857_v35  ;;  %v876_v0 = vmul.f32 %v1635_v63, %v1635_v63 }
 0x145   : > { %v921_v8 = vadd.f32 %v920_v5, %v858_v4  ;;  %v789_v10 = vadd.f32 %v1540_v1, %v788_v50  ;;  %v863_v1 = vmul.f32 %v1560_v23, %v1560_v23  ;;  %v878_v5 = vmul.f32 %v1645_v13, %v1645_v13 }
 0x147   : > { %v790_v60 = vadd.f32 %v789_v10, %v1555_v16  ;;  %v922_v14 = vadd.f32 %v921_v8, %v859_v45 }
 0x149   : > { %v923_v17 = vadd.f32 %v922_v14, %v860_v12  ;;  %v791_v19 = vadd.f32 %v1550_v11, %v790_v60  ;;  %v865_v11 = vmul.f32 %v1570_v36, %v1570_v36 }
 0x14b   : > { %v792_v6 = vadd.f32 %v791_v19, %v1565_v29  ;;  %v924_v22 = vadd.f32 %v923_v17, %v861_v55 }
 0x14d   : > { %v925_v26 = vadd.f32 %v924_v22, %v862_v20  ;;  %v793_v27 = vadd.f32 %v1560_v23, %v792_v6  ;;  %v867_v23 = vmul.f32 %v1580_v48, %v1580_v48 }
 0x14f   : > { %v794_v16 = vadd.f32 %v793_v27, %v1575_v42  ;;  %v926_v31 = vadd.f32 %v925_v26, %v863_v1 }
 0x151   : > { %v927_v33 = vadd.f32 %v926_v31, %v864_v28  ;;  %v795_v34 = vadd.f32 %v1570_v36, %v794_v16  ;;  %v869_v36 = vmul.f32 %v1590_v61, %v1590_v61 }
 0x153   : > { %v796_v29 = vadd.f32 %v795_v34, %v1585_v54  ;;  %v928_v38 = vadd.f32 %v927_v33, %v865_v11 }
 0x155   : > { %v929_v41 = vadd.f32 %v928_v38, %v866_v37  ;;  %v797_v43 = vadd.f32 %v1580_v48, %v796_v29  ;;  %v871_v48 = vmul.f32 %v1600_v9, %v1600_v9 }
 0x157   : > { %v798_v42 = vadd.f32 %v797_v43, %v1595_v3  ;;  %v930_v44 = vadd.f32 %v929_v41, %v867_v23 }
 0x159   : > { %v931_v46 = vadd.f32 %v930_v44, %v868_v21  ;;  %v799_v18 = vadd.f32 %v1590_v61, %v798_v42  ;;  %v873_v61 = vmul.f32 %v1610_v24, %v1610_v24 }
 0x15b   : > { %v800_v54 = vadd.f32 %v799_v18, %v1605_v15  ;;  %v932_v51 = vadd.f32 %v931_v46, %v869_v36 }
 0x15d   : > { %v933_v30 = vadd.f32 %v932_v51, %v870_v49  ;;  %v801_v52 = vadd.f32 %v1600_v9, %v800_v54  ;;  %v875_v9 = vmul.f32 %v1620_v39, %v1620_v39 }
 0x15f   : > { %v802_v3 = vadd.f32 %v801_v52, %v1615_v32  ;;  %v934_v25 = vadd.f32 %v933_v30, %v871_v48 }
 0x161   : > { %v935_v57 = vadd.f32 %v934_v25, %v872_v53  ;;  %v803_v58 = vadd.f32 %v1610_v24, %v802_v3  ;;  %v877_v24 = vmul.f32 %v1630_v56, %v1630_v56 }
 0x163   : > { %v804_v15 = vadd.f32 %v803_v58, %v1625_v47  ;;  %v936_v59 = vadd.f32 %v935_v57, %v873_v61 }
 0x165   : > { %v937_v62 = vadd.f32 %v936_v59, %v874_v40  ;;  %v805_v32 = vadd.f32 %v1620_v39, %v804_v15  ;;  %v879_v39 = vmul.f32 %v1640_v7, %v1640_v7 }
 0x167   : > { %v806_v35 = vadd.f32 %v805_v32, %v1635_v63  ;;  %v938_v2 = vadd.f32 %v937_v62, %v875_v9 }
 0x169   : > { %v939_v50 = vadd.f32 %v938_v2, %v876_v0  ;;  %v807_v47 = vadd.f32 %v1630_v56, %v806_v35 }
 0x16b   : > { %v808_v4 = vadd.f32 %v807_v47, %v1645_v13  ;;  %v940_v45 = vadd.f32 %v939_v50, %v877_v24 }
 0x16d   : > { %v809_v8 = vadd.f32 %v1640_v7, %v808_v4  ;;  %v941_v63 = vadd.f32 %v940_v45, %v878_v5 }
 0x16f   : > { %v810_v10 = vrot.slane %v809_v8, 4  ;;  %v942_v60 = vadd.f32 %v941_v63, %v879_v39 }
 0x171   : > { %v811_v12 = vadd.f32 %v810_v10, %v809_v8  ;;  %v943_v14 = vrot.slane %v942_v60, 4 }
 0x173   : > { %v812_v55 = vrot.slane %v811_v12, 2  ;;  %v944_v17 = vadd.f32 %v943_v14, %v942_v60 }
 0x175   : > { %v813_v56 = vadd.f32 %v812_v55, %v811_v12  ;;  %v945_v19 = vrot.slane %v944_v17, 2 }
 0x177   : > { %v814_v6 = vrot.slane %v813_v56, 1  ;;  %v946_v20 = vadd.f32 %v945_v19, %v944_v17 }
 0x179   : > { %v815_v13 = vadd.f32 %v814_v6, %v813_v56  ;;  %v947_v22 = vrot.slane %v946_v20, 1 }
 0x17b   : > { %v948_v7 = vadd.f32 %v947_v22, %v946_v20  ;;  %949 = vst [vmem:[%s214_s5] sm:$0x1] %v815_v13 }
 0x17d   : > { %950 = vst [vmem:[%s217_s12] sm:$0x1] %v948_v7 }
 0x17e PF: > { %s15_s15 = sadd.s32 1, %s1322_s15  }
 0x17f   : > { %p12_p5 = scmp.ge.s32.totalorder %s15_s15, 4  }
 0x181   :  { %14 = sbr.rel (!%p12_p5) target bundleno = 1 (0x1), region = 82 }

// kernel: conv_block1.6
= control target key start
LH: loop header
LB: loop body
LE: loop exit
PB: predicated region body
PF: predicated region fallthrough
CT: control target
= control target key end

     0   :  { %s1260_s15 = smov 0   ;;  %s1972_s0 = inlined_call_operand.vmem [shape: f32[1024,256], index: 0, kind: input, shape index: {}]   ;;  %s1973_s1 = inlined_call_operand.vmem [shape: f32[256,128], index: 1, kind: input, shape index: {}]   ;;  %s1974_s2 = inlined_call_operand.vmem [shape: f32[1024,128], index: 2, kind: output, shape index: {0}]   ;;  %s1975_s3 = inlined_call_operand.vmem [shape: f32[2,1,128], index: 3, kind: output, shape index: {1}]   ;;  %s1976_s4 = inlined_call_operand.vmem [shape: f32[2,1,128], index: 4, kind: output, shape index: {2}]  }
   0x1 LB: > { %s1266_s16 = sadd.s32 4294967295, %s1232_s15   ;;  %p1144_p0 = scmp.ge.s32.totalorder %s1232_s15, 1  ;;  %s1232_s15 = sphi %s1260_s15, %s15_s15  }
   0x2   : > { %p169_p1 = scmp.lt.s32.totalorder %s1232_s15, 3 }
   0x4   : > { %p170_p2 = pnand %p1144_p0, %p169_p1 }
   0x5   : > { %s1145_s19 = sshll.u32 (!%p170_p2), %s1266_s16, 6  ;;  %p215_p4 = scmp.lt.s32.totalorder (!%p170_p2), %s1266_s16, 1 }
   0x6   : > { %173 = sbr.rel (%p170_p2) target bundleno = 474 (0x1da), region = 28  ;;  %p203_p3 = scmp.lt.s32.totalorder (!%p170_p2), %s1145_s19, 127 }
   0xb   : > { %v364_v0 = vld [vmem:[%s1973_s1 + $0x78] sm:$0xff]  ;;  %v1234_v1 = vmov 0.0   ;;  %v363_v2 = vld [vmem:[%s1973_s1 + $0x70] sm:$0xff]  ;;  %v362_v3 = vld [vmem:[%s1973_s1 + $0x68] sm:$0xff]  ;;  %s1978_s19 = smov (!%p203_p3, %s1145_s19), 127  ;;  %s1980_s16 = smov (!%p215_p4, %s1266_s16), 1 }
   0xc   : > { %381 = vmatprep.subr.mxu0 %v1234_v1  ;;  %1153 = vmatprep.subr.mxu1 %v1234_v1  ;;  %v361_v4 = vld [vmem:[%s1973_s1 + $0x60] sm:$0xff]  ;;  %s1152_s26 = sshll.u32 %s1978_s19, 4  ;;  %v360_v5 = vld [vmem:[%s1973_s1 + $0x58] sm:$0xff]  ;;  %v359_v6 = vld [vmem:[%s1973_s1 + $0x50] sm:$0xff]  ;;  %s1149_s18 = sshll.u32 %s1978_s19, 3 }
   0xd   : > { %382 = vmatpush1.msra.mxu0 %v364_v0  ;;  %1185 = vmatpush1.msra.mxu1 %v364_v0  ;;  %s1299_s5 = scalar_lea.vmem %s1972_s0, %s1152_s26  ;;  %v358_v8 = vld [vmem:[%s1973_s1 + $0x48] sm:$0xff]  ;;  %v357_v9 = vld [vmem:[%s1973_s1 + $0x40] sm:$0xff]  ;;  %v356_v10 = vld [vmem:[%s1973_s1 + $0x38] sm:$0xff]  ;;  %s1571_s22 = scalar_lea.vmem %s1974_s2, %s1149_s18 }
   0xe   : > { %383 = vmatprep.subr.mxu0 %v1234_v1  ;;  %1154 = vmatprep.subr.mxu1 %v1234_v1  ;;  %v222_v7 = vld [vmem:[%s1299_s5 + $0x8] sm:$0xff]  ;;  %v355_v11 = vld [vmem:[%s1973_s1 + $0x30] sm:$0xff]  ;;  %v353_v13 = vld [vmem:[%s1973_s1 + $0x20] sm:$0xff]  ;;  %s217_s23 = scalar_lea.vmem %s1975_s3, %s1980_s16  ;;  %s220_s26 = scalar_lea.vmem %s1976_s4, %s1980_s16 }
   0xf   : > { %384 = vmatpush1.msra.mxu0 %v363_v2  ;;  %1186 = vmatpush1.msra.mxu1 %v363_v2  ;;  %v354_v12 = vld [vmem:[%s1973_s1 + $0x28] sm:$0xff]  ;;  %v352_v14 = vld [vmem:[%s1973_s1 + $0x18] sm:$0xff]  ;;  %v351_v15 = vld [vmem:[%s1973_s1 + $0x10] sm:$0xff] }
  0x10   : > { %385 = vmatprep.subr.mxu0 %v1234_v1  ;;  %1155 = vmatprep.subr.mxu1 %v1234_v1  ;;  %v350_v16 = vld [vmem:[%s1973_s1 + $0x8] sm:$0xff]  ;;  %v349_v17 = vld [vmem:[%s1973_s1] sm:$0xff]  ;;  %v380_v18 = vld [vmem:[%s1973_s1 + $0xf8] sm:$0xff] }
  0x11   : > { %386 = vmatpush1.msra.mxu0 %v362_v3  ;;  %1187 = vmatpush1.msra.mxu1 %v362_v3  ;;  %v379_v19 = vld [vmem:[%s1973_s1 + $0xf0] sm:$0xff]  ;;  %v378_v20 = vld [vmem:[%s1973_s1 + $0xe8] sm:$0xff]  ;;  %v377_v21 = vld [vmem:[%s1973_s1 + $0xe0] sm:$0xff] }
  0x12   : > { %387 = vmatprep.subr.mxu0 %v1234_v1  ;;  %1156 = vmatprep.subr.mxu1 %v1234_v1  ;;  %v376_v22 = vld [vmem:[%s1973_s1 + $0xd8] sm:$0xff]  ;;  %v375_v23 = vld [vmem:[%s1973_s1 + $0xd0] sm:$0xff]  ;;  %v374_v24 = vld [vmem:[%s1973_s1 + $0xc8] sm:$0xff] }
  0x13   : > { %388 = vmatpush1.msra.mxu0 %v361_v4  ;;  %1188 = vmatpush1.msra.mxu1 %v361_v4  ;;  %v373_v25 = vld [vmem:[%s1973_s1 + $0xc0] sm:$0xff]  ;;  %v372_v26 = vld [vmem:[%s1973_s1 + $0xb8] sm:$0xff]  ;;  %v371_v27 = vld [vmem:[%s1973_s1 + $0xb0] sm:$0xff] }
  0x14   : > { %389 = vmatprep.subr.mxu0 %v1234_v1  ;;  %1157 = vmatprep.subr.mxu1 %v1234_v1  ;;  %v370_v28 = vld [vmem:[%s1973_s1 + $0xa8] sm:$0xff]  ;;  %v369_v29 = vld [vmem:[%s1973_s1 + $0xa0] sm:$0xff]  ;;  %v368_v30 = vld [vmem:[%s1973_s1 + $0x98] sm:$0xff] }
  0x15   : > { %390 = vmatpush1.msra.mxu0 %v360_v5  ;;  %1189 = vmatpush1.msra.mxu1 %v360_v5  ;;  %v367_v31 = vld [vmem:[%s1973_s1 + $0x90] sm:$0xff]  ;;  %v366_v32 = vld [vmem:[%s1973_s1 + $0x88] sm:$0xff]  ;;  %v365_v33 = vld [vmem:[%s1973_s1 + $0x80] sm:$0xff] }
  0x16   : > { %391 = vmatprep.subr.mxu0 %v1234_v1  ;;  %445 = vmatprep.mubr.f32.mxu0 %v222_v7  ;;  %v221_v34 = vld [vmem:[%s1299_s5] sm:$0xff]  ;;  %v224_v35 = vld [vmem:[%s1299_s5 + $0x18] sm:$0xff]  ;;  %v286_v36 = vld [vmem:[%s1299_s5 + $0x208] sm:$0xff] }
  0x17   : > { %392 = vmatpush1.msra.mxu0 %v359_v6  ;;  %1158 = vmatprep.subr.mxu1 %v1234_v1  ;;  %v285_v37 = vld [vmem:[%s1299_s5 + $0x200] sm:$0xff]  ;;  %v288_v38 = vld [vmem:[%s1299_s5 + $0x218] sm:$0xff]  ;;  %v223_v39 = vld [vmem:[%s1299_s5 + $0x10] sm:$0xff] }
  0x18   : > { %393 = vmatprep.subr.mxu0 %v1234_v1  ;;  %1190 = vmatpush1.msra.mxu1 %v359_v6  ;;  %v226_v40 = vld [vmem:[%s1299_s5 + $0x28] sm:$0xff]  ;;  %v287_v41 = vld [vmem:[%s1299_s5 + $0x210] sm:$0xff]  ;;  %v225_v43 = vld [vmem:[%s1299_s5 + $0x20] sm:$0xff] }
  0x19   : > { %394 = vmatpush1.msra.mxu0 %v358_v8  ;;  %1159 = vmatprep.subr.mxu1 %v1234_v1  ;;  %v290_v42 = vld [vmem:[%s1299_s5 + $0x228] sm:$0xff]  ;;  %v228_v44 = vld [vmem:[%s1299_s5 + $0x38] sm:$0xff]  ;;  %v289_v45 = vld [vmem:[%s1299_s5 + $0x220] sm:$0xff] }
  0x1a   : > { %395 = vmatprep.subr.mxu0 %v1234_v1  ;;  %1191 = vmatpush1.msra.mxu1 %v358_v8  ;;  %v292_v46 = vld [vmem:[%s1299_s5 + $0x238] sm:$0xff]  ;;  %v227_v47 = vld [vmem:[%s1299_s5 + $0x30] sm:$0xff]  ;;  %v230_v48 = vld [vmem:[%s1299_s5 + $0x48] sm:$0xff] }
  0x1b   : > { %396 = vmatpush1.msra.mxu0 %v357_v9  ;;  %1160 = vmatprep.subr.mxu1 %v1234_v1  ;;  %v291_v49 = vld [vmem:[%s1299_s5 + $0x230] sm:$0xff]  ;;  %v294_v50 = vld [vmem:[%s1299_s5 + $0x248] sm:$0xff]  ;;  %v229_v51 = vld [vmem:[%s1299_s5 + $0x40] sm:$0xff] }
  0x1c   : > { %397 = vmatprep.subr.mxu0 %v1234_v1  ;;  %1192 = vmatpush1.msra.mxu1 %v357_v9  ;;  %v232_v52 = vld [vmem:[%s1299_s5 + $0x58] sm:$0xff]  ;;  %v293_v53 = vld [vmem:[%s1299_s5 + $0x240] sm:$0xff]  ;;  %v231_v55 = vld [vmem:[%s1299_s5 + $0x50] sm:$0xff] }
  0x1d   : > { %398 = vmatpush1.msra.mxu0 %v356_v10  ;;  %1161 = vmatprep.subr.mxu1 %v1234_v1  ;;  %v296_v54 = vld [vmem:[%s1299_s5 + $0x258] sm:$0xff]  ;;  %v234_v56 = vld [vmem:[%s1299_s5 + $0x68] sm:$0xff]  ;;  %v295_v57 = vld [vmem:[%s1299_s5 + $0x250] sm:$0xff] }
  0x1e   : > { %399 = vmatprep.subr.mxu0 %v1234_v1  ;;  %1193 = vmatpush1.msra.mxu1 %v356_v10  ;;  %v298_v58 = vld [vmem:[%s1299_s5 + $0x268] sm:$0xff]  ;;  %v233_v59 = vld [vmem:[%s1299_s5 + $0x60] sm:$0xff]  ;;  %v236_v60 = vld [vmem:[%s1299_s5 + $0x78] sm:$0xff] }
  0x1f   : > { %400 = vmatpush1.msra.mxu0 %v355_v11  ;;  %1162 = vmatprep.subr.mxu1 %v1234_v1  ;;  %v297_v61 = vld [vmem:[%s1299_s5 + $0x260] sm:$0xff]  ;;  %v300_v62 = vld [vmem:[%s1299_s5 + $0x278] sm:$0xff]  ;;  %v235_v63 = vld [vmem:[%s1299_s5 + $0x70] sm:$0xff] }
  0x20   : > { %401 = vmatprep.subr.mxu0 %v1234_v1  ;;  %1194 = vmatpush1.msra.mxu1 %v355_v11  ;;  %v238_v0 = vld [vmem:[%s1299_s5 + $0x88] sm:$0xff]  ;;  %v237_v3 = vld [vmem:[%s1299_s5 + $0x80] sm:$0xff]  ;;  %v240_v4 = vld [vmem:[%s1299_s5 + $0x98] sm:$0xff] }
  0x21   : > { %402 = vmatpush1.msra.mxu0 %v354_v12  ;;  %1163 = vmatprep.subr.mxu1 %v1234_v1  ;;  %v302_v2 = vld [vmem:[%s1299_s5 + $0x288] sm:$0xff]  ;;  %v301_v5 = vld [vmem:[%s1299_s5 + $0x280] sm:$0xff]  ;;  %v304_v6 = vld [vmem:[%s1299_s5 + $0x298] sm:$0xff] }
  0x22   : > { %403 = vmatprep.subr.mxu0 %v1234_v1  ;;  %1195 = vmatpush1.msra.mxu1 %v354_v12  ;;  %v239_v7 = vld [vmem:[%s1299_s5 + $0x90] sm:$0xff]  ;;  %v242_v8 = vld [vmem:[%s1299_s5 + $0xa8] sm:$0xff]  ;;  %v241_v11 = vld [vmem:[%s1299_s5 + $0xa0] sm:$0xff] }
  0x23   : > { %404 = vmatpush1.msra.mxu0 %v353_v13  ;;  %1164 = vmatprep.subr.mxu1 %v1234_v1  ;;  %v303_v9 = vld [vmem:[%s1299_s5 + $0x290] sm:$0xff]  ;;  %v306_v10 = vld [vmem:[%s1299_s5 + $0x2a8] sm:$0xff]  ;;  %v244_v12 = vld [vmem:[%s1299_s5 + $0xb8] sm:$0xff] }
  0x24   : > { %405 = vmatprep.subr.mxu0 %v1234_v1  ;;  %1196 = vmatpush1.msra.mxu1 %v353_v13  ;;  %v305_v13 = vld [vmem:[%s1299_s5 + $0x2a0] sm:$0xff] }
  0x25   : > { %406 = vmatpush1.msra.mxu0 %v352_v14  ;;  %1165 = vmatprep.subr.mxu1 %v1234_v1 }
  0x26   : > { %407 = vmatprep.subr.mxu0 %v1234_v1  ;;  %1197 = vmatpush1.msra.mxu1 %v352_v14  ;;  %v308_v14 = vld [vmem:[%s1299_s5 + $0x2b8] sm:$0xff] }
  0x27   : > { %408 = vmatpush1.msra.mxu0 %v351_v15  ;;  %1166 = vmatprep.subr.mxu1 %v1234_v1 }
  0x28   : > { %409 = vmatprep.subr.mxu0 %v1234_v1  ;;  %1198 = vmatpush1.msra.mxu1 %v351_v15  ;;  %v243_v15 = vld [vmem:[%s1299_s5 + $0xb0] sm:$0xff] }
  0x29   : > { %410 = vmatpush1.msra.mxu0 %v350_v16  ;;  %1167 = vmatprep.subr.mxu1 %v1234_v1 }
  0x2a   : > { %411 = vmatprep.subr.mxu0 %v1234_v1  ;;  %1199 = vmatpush1.msra.mxu1 %v350_v16  ;;  %v246_v16 = vld [vmem:[%s1299_s5 + $0xc8] sm:$0xff] }
  0x2b   : > { %412 = vmatpush1.msra.mxu0 %v349_v17  ;;  %1168 = vmatprep.subr.mxu1 %v1234_v1 }
  0x2c   : > { %413 = vmatprep.subr.mxu0 %v1234_v1  ;;  %1200 = vmatpush1.msra.mxu1 %v349_v17  ;;  %v307_v17 = vld [vmem:[%s1299_s5 + $0x2b0] sm:$0xff] }
  0x2d   : > { %414 = vmatpush2.msra.mxu0 %v380_v18  ;;  %1169 = vmatprep.subr.mxu1 %v1234_v1 }
  0x2e   : > { %415 = vmatprep.subr.mxu0 %v1234_v1  ;;  %1201 = vmatpush2.msra.mxu1 %v380_v18  ;;  %v310_v18 = vld [vmem:[%s1299_s5 + $0x2c8] sm:$0xff] }
  0x2f   : > { %416 = vmatpush2.msra.mxu0 %v379_v19  ;;  %1170 = vmatprep.subr.mxu1 %v1234_v1 }
  0x30   : > { %417 = vmatprep.subr.mxu0 %v1234_v1  ;;  %1202 = vmatpush2.msra.mxu1 %v379_v19  ;;  %v245_v19 = vld [vmem:[%s1299_s5 + $0xc0] sm:$0xff] }
  0x31   : > { %418 = vmatpush2.msra.mxu0 %v378_v20  ;;  %1171 = vmatprep.subr.mxu1 %v1234_v1 }
  0x32   : > { %419 = vmatprep.subr.mxu0 %v1234_v1  ;;  %1203 = vmatpush2.msra.mxu1 %v378_v20  ;;  %v248_v20 = vld [vmem:[%s1299_s5 + $0xd8] sm:$0xff] }
  0x33   : > { %420 = vmatpush2.msra.mxu0 %v377_v21  ;;  %1172 = vmatprep.subr.mxu1 %v1234_v1 }
  0x34   : > { %421 = vmatprep.subr.mxu0 %v1234_v1  ;;  %1204 = vmatpush2.msra.mxu1 %v377_v21  ;;  %v309_v21 = vld [vmem:[%s1299_s5 + $0x2c0] sm:$0xff] }
  0x35   : > { %422 = vmatpush2.msra.mxu0 %v376_v22  ;;  %1173 = vmatprep.subr.mxu1 %v1234_v1 }
  0x36   : > { %423 = vmatprep.subr.mxu0 %v1234_v1  ;;  %1205 = vmatpush2.msra.mxu1 %v376_v22  ;;  %v312_v22 = vld [vmem:[%s1299_s5 + $0x2d8] sm:$0xff] }
  0x37   : > { %424 = vmatpush2.msra.mxu0 %v375_v23  ;;  %1174 = vmatprep.subr.mxu1 %v1234_v1 }
  0x38   : > { %425 = vmatprep.subr.mxu0 %v1234_v1  ;;  %1206 = vmatpush2.msra.mxu1 %v375_v23  ;;  %v247_v23 = vld [vmem:[%s1299_s5 + $0xd0] sm:$0xff] }
  0x39   : > { %426 = vmatpush2.msra.mxu0 %v374_v24  ;;  %1175 = vmatprep.subr.mxu1 %v1234_v1 }
  0x3a   : > { %427 = vmatprep.subr.mxu0 %v1234_v1  ;;  %1207 = vmatpush2.msra.mxu1 %v374_v24  ;;  %v250_v24 = vld [vmem:[%s1299_s5 + $0xe8] sm:$0xff] }
  0x3b   : > { %428 = vmatpush2.msra.mxu0 %v373_v25  ;;  %1176 = vmatprep.subr.mxu1 %v1234_v1 }
  0x3c   : > { %429 = vmatprep.subr.mxu0 %v1234_v1  ;;  %1208 = vmatpush2.msra.mxu1 %v373_v25  ;;  %v311_v25 = vld [vmem:[%s1299_s5 + $0x2d0] sm:$0xff] }
  0x3d   : > { %430 = vmatpush2.msra.mxu0 %v372_v26  ;;  %1177 = vmatprep.subr.mxu1 %v1234_v1 }
  0x3e   : > { %431 = vmatprep.subr.mxu0 %v1234_v1  ;;  %1209 = vmatpush2.msra.mxu1 %v372_v26  ;;  %v314_v26 = vld [vmem:[%s1299_s5 + $0x2e8] sm:$0xff] }
  0x3f   : > { %432 = vmatpush2.msra.mxu0 %v371_v27  ;;  %1178 = vmatprep.subr.mxu1 %v1234_v1 }
  0x40   : > { %433 = vmatprep.subr.mxu0 %v1234_v1  ;;  %1210 = vmatpush2.msra.mxu1 %v371_v27  ;;  %v249_v27 = vld [vmem:[%s1299_s5 + $0xe0] sm:$0xff] }
  0x41   : > { %434 = vmatpush2.msra.mxu0 %v370_v28  ;;  %1179 = vmatprep.subr.mxu1 %v1234_v1 }
  0x42   : > { %435 = vmatprep.subr.mxu0 %v1234_v1  ;;  %1211 = vmatpush2.msra.mxu1 %v370_v28  ;;  %v252_v28 = vld [vmem:[%s1299_s5 + $0xf8] sm:$0xff] }
  0x43   : > { %436 = vmatpush2.msra.mxu0 %v369_v29  ;;  %1180 = vmatprep.subr.mxu1 %v1234_v1 }
  0x44   : > { %437 = vmatprep.subr.mxu0 %v1234_v1  ;;  %1212 = vmatpush2.msra.mxu1 %v369_v29  ;;  %v313_v29 = vld [vmem:[%s1299_s5 + $0x2e0] sm:$0xff] }
  0x45   : > { %438 = vmatpush2.msra.mxu0 %v368_v30  ;;  %1181 = vmatprep.subr.mxu1 %v1234_v1 }
  0x46   : > { %439 = vmatprep.subr.mxu0 %v1234_v1  ;;  %1213 = vmatpush2.msra.mxu1 %v368_v30  ;;  %v316_v30 = vld [vmem:[%s1299_s5 + $0x2f8] sm:$0xff] }
  0x47   : > { %440 = vmatpush2.msra.mxu0 %v367_v31  ;;  %1182 = vmatprep.subr.mxu1 %v1234_v1 }
  0x48   : > { %441 = vmatprep.subr.mxu0 %v1234_v1  ;;  %1214 = vmatpush2.msra.mxu1 %v367_v31  ;;  %v251_v31 = vld [vmem:[%s1299_s5 + $0xf0] sm:$0xff] }
  0x49   : > { %442 = vmatpush2.msra.mxu0 %v366_v32  ;;  %1183 = vmatprep.subr.mxu1 %v1234_v1 }
  0x4a   : > { %443 = vmatprep.subr.mxu0 %v1234_v1  ;;  %1215 = vmatpush2.msra.mxu1 %v366_v32  ;;  %v254_v32 = vld [vmem:[%s1299_s5 + $0x108] sm:$0xff] }
  0x4b   : > { %444 = vmatpush2.msra.mxu0 %v365_v33  ;;  %1184 = vmatprep.subr.mxu1 %v1234_v1  ;;  %v299_v1 = vld [vmem:[%s1299_s5 + $0x270] sm:$0xff] }
  0x4c   : > { %446 = vmatmul.mubr.f32.vlgmr.msra.gmra.mxu0 %v221_v34  ;;  %1216 = vmatpush2.msra.mxu1 %v365_v33  ;;  %v315_v33 = vld [vmem:[%s1299_s5 + $0x2f0] sm:$0xff]  ;;  %v318_v34 = vld [vmem:[%s1299_s5 + $0x308] sm:$0xff] }
  0x4d   : > { %450 = vmatprep.mubr.f32.mxu0 %v224_v35  ;;  %605 = vmatprep.mubr.f32.mxu1 %v286_v36  ;;  %v253_v35 = vld [vmem:[%s1299_s5 + $0x100] sm:$0xff]  ;;  %v256_v36 = vld [vmem:[%s1299_s5 + $0x118] sm:$0xff] }
  0x4e   : > { %606 = vmatmul.mubr.f32.vlgmr.msra.gmra.mxu1 %v285_v37  ;;  %v317_v37 = vld [vmem:[%s1299_s5 + $0x300] sm:$0xff] }
  0x4f   : > { %610 = vmatprep.mubr.f32.mxu1 %v288_v38  ;;  %v320_v38 = vld [vmem:[%s1299_s5 + $0x318] sm:$0xff] }
  0x50   : > { %451 = vmatmul.mubr.f32.gmra.mxu0 %v223_v39  ;;  %v255_v39 = vld [vmem:[%s1299_s5 + $0x110] sm:$0xff] }
  0x51   : > { %455 = vmatprep.mubr.f32.mxu0 %v226_v40  ;;  %v258_v40 = vld [vmem:[%s1299_s5 + $0x128] sm:$0xff] }
  0x52   : > { %611 = vmatmul.mubr.f32.gmra.mxu1 %v287_v41  ;;  %v319_v41 = vld [vmem:[%s1299_s5 + $0x310] sm:$0xff] }
  0x53   : > { %615 = vmatprep.mubr.f32.mxu1 %v290_v42  ;;  %v322_v42 = vld [vmem:[%s1299_s5 + $0x328] sm:$0xff] }
  0x54   : > { %456 = vmatmul.mubr.f32.gmra.mxu0 %v225_v43  ;;  %v257_v43 = vld [vmem:[%s1299_s5 + $0x120] sm:$0xff] }
  0x55   : > { %460 = vmatprep.mubr.f32.mxu0 %v228_v44  ;;  %v260_v44 = vld [vmem:[%s1299_s5 + $0x138] sm:$0xff] }
  0x56   : > { %616 = vmatmul.mubr.f32.gmra.mxu1 %v289_v45  ;;  %v321_v45 = vld [vmem:[%s1299_s5 + $0x320] sm:$0xff] }
  0x57   : > { %620 = vmatprep.mubr.f32.mxu1 %v292_v46  ;;  %v324_v46 = vld [vmem:[%s1299_s5 + $0x338] sm:$0xff] }
  0x58   : > { %461 = vmatmul.mubr.f32.gmra.mxu0 %v227_v47  ;;  %v259_v47 = vld [vmem:[%s1299_s5 + $0x130] sm:$0xff] }
  0x59   : > { %465 = vmatprep.mubr.f32.mxu0 %v230_v48  ;;  %v262_v48 = vld [vmem:[%s1299_s5 + $0x148] sm:$0xff] }
  0x5a   : > { %621 = vmatmul.mubr.f32.gmra.mxu1 %v291_v49  ;;  %v323_v49 = vld [vmem:[%s1299_s5 + $0x330] sm:$0xff] }
  0x5b   : > { %625 = vmatprep.mubr.f32.mxu1 %v294_v50  ;;  %v326_v50 = vld [vmem:[%s1299_s5 + $0x348] sm:$0xff] }
  0x5c   : > { %466 = vmatmul.mubr.f32.gmra.mxu0 %v229_v51  ;;  %v261_v51 = vld [vmem:[%s1299_s5 + $0x140] sm:$0xff] }
  0x5d   : > { %470 = vmatprep.mubr.f32.mxu0 %v232_v52  ;;  %v264_v52 = vld [vmem:[%s1299_s5 + $0x158] sm:$0xff] }
  0x5e   : > { %626 = vmatmul.mubr.f32.gmra.mxu1 %v293_v53  ;;  %v325_v53 = vld [vmem:[%s1299_s5 + $0x340] sm:$0xff] }
  0x5f   : > { %630 = vmatprep.mubr.f32.mxu1 %v296_v54  ;;  %v328_v54 = vld [vmem:[%s1299_s5 + $0x358] sm:$0xff] }
  0x60   : > { %471 = vmatmul.mubr.f32.gmra.mxu0 %v231_v55  ;;  %v263_v55 = vld [vmem:[%s1299_s5 + $0x150] sm:$0xff] }
  0x61   : > { %475 = vmatprep.mubr.f32.mxu0 %v234_v56  ;;  %v266_v56 = vld [vmem:[%s1299_s5 + $0x168] sm:$0xff] }
  0x62   : > { %631 = vmatmul.mubr.f32.gmra.mxu1 %v295_v57  ;;  %v327_v57 = vld [vmem:[%s1299_s5 + $0x350] sm:$0xff] }
  0x63   : > { %635 = vmatprep.mubr.f32.mxu1 %v298_v58  ;;  %v330_v58 = vld [vmem:[%s1299_s5 + $0x368] sm:$0xff] }
  0x64   : > { %476 = vmatmul.mubr.f32.gmra.mxu0 %v233_v59  ;;  %v265_v59 = vld [vmem:[%s1299_s5 + $0x160] sm:$0xff] }
  0x65   : > { %480 = vmatprep.mubr.f32.mxu0 %v236_v60  ;;  %v268_v60 = vld [vmem:[%s1299_s5 + $0x178] sm:$0xff] }
  0x66   : > { %636 = vmatmul.mubr.f32.gmra.mxu1 %v297_v61  ;;  %v329_v61 = vld [vmem:[%s1299_s5 + $0x360] sm:$0xff] }
  0x67   : > { %640 = vmatprep.mubr.f32.mxu1 %v300_v62  ;;  %v332_v62 = vld [vmem:[%s1299_s5 + $0x378] sm:$0xff] }
  0x68   : > { %481 = vmatmul.mubr.f32.gmra.mxu0 %v235_v63  ;;  %v267_v63 = vld [vmem:[%s1299_s5 + $0x170] sm:$0xff] }
  0x69   : > { %485 = vmatprep.mubr.f32.mxu0 %v238_v0  ;;  %v270_v0 = vld [vmem:[%s1299_s5 + $0x188] sm:$0xff] }
  0x6a   : > { %641 = vmatmul.mubr.f32.gmra.mxu1 %v299_v1  ;;  %v331_v1 = vld [vmem:[%s1299_s5 + $0x370] sm:$0xff] }
  0x6b   : > { %645 = vmatprep.mubr.f32.mxu1 %v302_v2  ;;  %v334_v2 = vld [vmem:[%s1299_s5 + $0x388] sm:$0xff] }
  0x6c   : > { %486 = vmatmul.mubr.f32.gmra.mxu0 %v237_v3  ;;  %v269_v3 = vld [vmem:[%s1299_s5 + $0x180] sm:$0xff] }
  0x6d   : > { %490 = vmatprep.mubr.f32.mxu0 %v240_v4  ;;  %v272_v4 = vld [vmem:[%s1299_s5 + $0x198] sm:$0xff] }
  0x6e   : > { %646 = vmatmul.mubr.f32.gmra.mxu1 %v301_v5  ;;  %v333_v5 = vld [vmem:[%s1299_s5 + $0x380] sm:$0xff] }
  0x6f   : > { %650 = vmatprep.mubr.f32.mxu1 %v304_v6  ;;  %v336_v6 = vld [vmem:[%s1299_s5 + $0x398] sm:$0xff] }
  0x70   : > { %491 = vmatmul.mubr.f32.gmra.mxu0 %v239_v7  ;;  %v271_v7 = vld [vmem:[%s1299_s5 + $0x190] sm:$0xff] }
  0x71   : > { %495 = vmatprep.mubr.f32.mxu0 %v242_v8  ;;  %v274_v8 = vld [vmem:[%s1299_s5 + $0x1a8] sm:$0xff] }
  0x72   : > { %651 = vmatmul.mubr.f32.gmra.mxu1 %v303_v9  ;;  %v335_v9 = vld [vmem:[%s1299_s5 + $0x390] sm:$0xff] }
  0x73   : > { %655 = vmatprep.mubr.f32.mxu1 %v306_v10  ;;  %v338_v10 = vld [vmem:[%s1299_s5 + $0x3a8] sm:$0xff] }
  0x74   : > { %496 = vmatmul.mubr.f32.gmra.mxu0 %v241_v11  ;;  %v273_v11 = vld [vmem:[%s1299_s5 + $0x1a0] sm:$0xff] }
  0x75   : > { %500 = vmatprep.mubr.f32.mxu0 %v244_v12  ;;  %v276_v12 = vld [vmem:[%s1299_s5 + $0x1b8] sm:$0xff] }
  0x76   : > { %656 = vmatmul.mubr.f32.gmra.mxu1 %v305_v13  ;;  %v337_v13 = vld [vmem:[%s1299_s5 + $0x3a0] sm:$0xff] }
  0x77   : > { %660 = vmatprep.mubr.f32.mxu1 %v308_v14  ;;  %v340_v14 = vld [vmem:[%s1299_s5 + $0x3b8] sm:$0xff] }
  0x78   : > { %501 = vmatmul.mubr.f32.gmra.mxu0 %v243_v15  ;;  %v275_v15 = vld [vmem:[%s1299_s5 + $0x1b0] sm:$0xff] }
  0x79   : > { %505 = vmatprep.mubr.f32.mxu0 %v246_v16  ;;  %v278_v16 = vld [vmem:[%s1299_s5 + $0x1c8] sm:$0xff] }
  0x7a   : > { %661 = vmatmul.mubr.f32.gmra.mxu1 %v307_v17  ;;  %v339_v17 = vld [vmem:[%s1299_s5 + $0x3b0] sm:$0xff] }
  0x7b   : > { %665 = vmatprep.mubr.f32.mxu1 %v310_v18  ;;  %v342_v18 = vld [vmem:[%s1299_s5 + $0x3c8] sm:$0xff] }
  0x7c   : > { %506 = vmatmul.mubr.f32.gmra.mxu0 %v245_v19  ;;  %v277_v19 = vld [vmem:[%s1299_s5 + $0x1c0] sm:$0xff] }
  0x7d   : > { %510 = vmatprep.mubr.f32.mxu0 %v248_v20  ;;  %v280_v20 = vld [vmem:[%s1299_s5 + $0x1d8] sm:$0xff] }
  0x7e   : > { %666 = vmatmul.mubr.f32.gmra.mxu1 %v309_v21  ;;  %v341_v21 = vld [vmem:[%s1299_s5 + $0x3c0] sm:$0xff] }
  0x7f   : > { %670 = vmatprep.mubr.f32.mxu1 %v312_v22  ;;  %v344_v22 = vld [vmem:[%s1299_s5 + $0x3d8] sm:$0xff] }
  0x80   : > { %511 = vmatmul.mubr.f32.gmra.mxu0 %v247_v23  ;;  %v279_v23 = vld [vmem:[%s1299_s5 + $0x1d0] sm:$0xff] }
  0x81   : > { %515 = vmatprep.mubr.f32.mxu0 %v250_v24  ;;  %v282_v24 = vld [vmem:[%s1299_s5 + $0x1e8] sm:$0xff] }
  0x82   : > { %671 = vmatmul.mubr.f32.gmra.mxu1 %v311_v25  ;;  %v343_v25 = vld [vmem:[%s1299_s5 + $0x3d0] sm:$0xff] }
  0x83   : > { %675 = vmatprep.mubr.f32.mxu1 %v314_v26  ;;  %v346_v26 = vld [vmem:[%s1299_s5 + $0x3e8] sm:$0xff] }
  0x84   : > { %516 = vmatmul.mubr.f32.gmra.mxu0 %v249_v27  ;;  %v281_v27 = vld [vmem:[%s1299_s5 + $0x1e0] sm:$0xff] }
  0x85   : > { %520 = vmatprep.mubr.f32.mxu0 %v252_v28  ;;  %v284_v28 = vld [vmem:[%s1299_s5 + $0x1f8] sm:$0xff] }
  0x86   : > { %676 = vmatmul.mubr.f32.gmra.mxu1 %v313_v29  ;;  %v345_v29 = vld [vmem:[%s1299_s5 + $0x3e0] sm:$0xff] }
  0x87   : > { %680 = vmatprep.mubr.f32.mxu1 %v316_v30  ;;  %v348_v30 = vld [vmem:[%s1299_s5 + $0x3f8] sm:$0xff] }
  0x88   : > { %521 = vmatmul.mubr.f32.gmra.mxu0 %v251_v31  ;;  %v283_v31 = vld [vmem:[%s1299_s5 + $0x1f0] sm:$0xff] }
  0x89   : > { %525 = vmatprep.mubr.f32.mxu0 %v254_v32  ;;  %v347_v32 = vld [vmem:[%s1299_s5 + $0x3f0] sm:$0xff] }
  0x8a   : > { %681 = vmatmul.mubr.f32.gmra.mxu1 %v315_v33 }
  0x8b   : > { %685 = vmatprep.mubr.f32.mxu1 %v318_v34 }
  0x8c   : > { %526 = vmatmul.mubr.f32.gmra.mxu0 %v253_v35 }
  0x8d   : > { %530 = vmatprep.mubr.f32.mxu0 %v256_v36 }
  0x8e   : > { %686 = vmatmul.mubr.f32.gmra.mxu1 %v317_v37 }
  0x8f   : > { %690 = vmatprep.mubr.f32.mxu1 %v320_v38 }
  0x90   : > { %531 = vmatmul.mubr.f32.gmra.mxu0 %v255_v39 }
  0x91   : > { %535 = vmatprep.mubr.f32.mxu0 %v258_v40 }
  0x92   : > { %691 = vmatmul.mubr.f32.gmra.mxu1 %v319_v41 }
  0x93   : > { %695 = vmatprep.mubr.f32.mxu1 %v322_v42 }
  0x94   : > { %536 = vmatmul.mubr.f32.gmra.mxu0 %v257_v43 }
  0x95   : > { %540 = vmatprep.mubr.f32.mxu0 %v260_v44 }
  0x96   : > { %696 = vmatmul.mubr.f32.gmra.mxu1 %v321_v45 }
  0x97   : > { %700 = vmatprep.mubr.f32.mxu1 %v324_v46 }
  0x98   : > { %541 = vmatmul.mubr.f32.gmra.mxu0 %v259_v47 }
  0x99   : > { %545 = vmatprep.mubr.f32.mxu0 %v262_v48 }
  0x9a   : > { %701 = vmatmul.mubr.f32.gmra.mxu1 %v323_v49 }
  0x9b   : > { %705 = vmatprep.mubr.f32.mxu1 %v326_v50 }
  0x9c   : > { %546 = vmatmul.mubr.f32.gmra.mxu0 %v261_v51 }
  0x9d   : > { %550 = vmatprep.mubr.f32.mxu0 %v264_v52 }
  0x9e   : > { %706 = vmatmul.mubr.f32.gmra.mxu1 %v325_v53 }
  0x9f   : > { %710 = vmatprep.mubr.f32.mxu1 %v328_v54 }
  0xa0   : > { %551 = vmatmul.mubr.f32.gmra.mxu0 %v263_v55 }
  0xa1   : > { %555 = vmatprep.mubr.f32.mxu0 %v266_v56 }
  0xa2   : > { %711 = vmatmul.mubr.f32.gmra.mxu1 %v327_v57 }
  0xa3   : > { %715 = vmatprep.mubr.f32.mxu1 %v330_v58 }
  0xa4   : > { %556 = vmatmul.mubr.f32.gmra.mxu0 %v265_v59 }
  0xa5   : > { %560 = vmatprep.mubr.f32.mxu0 %v268_v60 }
  0xa6   : > { %716 = vmatmul.mubr.f32.gmra.mxu1 %v329_v61 }
  0xa7   : > { %720 = vmatprep.mubr.f32.mxu1 %v332_v62 }
  0xa8   : > { %561 = vmatmul.mubr.f32.gmra.mxu0 %v267_v63 }
  0xa9   : > { %565 = vmatprep.mubr.f32.mxu0 %v270_v0 }
  0xaa   : > { %721 = vmatmul.mubr.f32.gmra.mxu1 %v331_v1 }
  0xab   : > { %725 = vmatprep.mubr.f32.mxu1 %v334_v2 }
  0xac   : > { %566 = vmatmul.mubr.f32.gmra.mxu0 %v269_v3 }
  0xad   : > { %570 = vmatprep.mubr.f32.mxu0 %v272_v4 }
  0xae   : > { %726 = vmatmul.mubr.f32.gmra.mxu1 %v333_v5 }
  0xaf   : > { %730 = vmatprep.mubr.f32.mxu1 %v336_v6 }
  0xb0   : > { %571 = vmatmul.mubr.f32.gmra.mxu0 %v271_v7 }
  0xb1   : > { %575 = vmatprep.mubr.f32.mxu0 %v274_v8 }
  0xb2   : > { %731 = vmatmul.mubr.f32.gmra.mxu1 %v335_v9 }
  0xb3   : > { %735 = vmatprep.mubr.f32.mxu1 %v338_v10 }
  0xb4   : > { %576 = vmatmul.mubr.f32.gmra.mxu0 %v273_v11 }
  0xb5   : > { %580 = vmatprep.mubr.f32.mxu0 %v276_v12 }
  0xb6   : > { %736 = vmatmul.mubr.f32.gmra.mxu1 %v337_v13 }
  0xb7   : > { %740 = vmatprep.mubr.f32.mxu1 %v340_v14 }
  0xb8   : > { %581 = vmatmul.mubr.f32.gmra.mxu0 %v275_v15 }
  0xb9   : > { %585 = vmatprep.mubr.f32.mxu0 %v278_v16 }
  0xba   : > { %741 = vmatmul.mubr.f32.gmra.mxu1 %v339_v17 }
  0xbb   : > { %745 = vmatprep.mubr.f32.mxu1 %v342_v18 }
  0xbc   : > { %586 = vmatmul.mubr.f32.gmra.mxu0 %v277_v19 }
  0xbd   : > { %590 = vmatprep.mubr.f32.mxu0 %v280_v20 }
  0xbe   : > { %746 = vmatmul.mubr.f32.gmra.mxu1 %v341_v21 }
  0xbf   : > { %750 = vmatprep.mubr.f32.mxu1 %v344_v22 }
  0xc0   : > { %591 = vmatmul.mubr.f32.gmra.mxu0 %v279_v23 }
  0xc1   : > { %595 = vmatprep.mubr.f32.mxu0 %v282_v24 }
  0xc2   : > { %751 = vmatmul.mubr.f32.gmra.mxu1 %v343_v25 }
  0xc3   : > { %755 = vmatprep.mubr.f32.mxu1 %v346_v26 }
  0xc4   : > { %596 = vmatmul.mubr.f32.gmra.mxu0 %v281_v27 }
  0xc5   : > { %600 = vmatprep.mubr.f32.mxu0 %v284_v28 }
  0xc6   : > { %756 = vmatmul.mubr.f32.gmra.mxu1 %v345_v29 }
  0xc7   : > { %760 = vmatprep.mubr.f32.mxu1 %v348_v30 }
  0xc8   : > { %601 = vmatmul.mubr.f32.gmra.mxu0 %v283_v31 }
  0xca   : > { %761 = vmatmul.mubr.f32.gmra.mxu1 %v347_v32 }
 0x10c   : > { %v1573_v33 = vpop.f32.mrf.mxu0 }
 0x10d   : > { %766 = vst [vmem:[%s1571_s22] sm:$0xff] %v1573_v33 }
 0x10e   : > { %v449_v34 = vpop.f32.mrf.mxu0  ;;  %v1577_v35 = vpop.f32.mrf.mxu1 }
 0x10f   : > { %798 = vst [vmem:[%s1571_s22 + $0x100] sm:$0xff] %v1577_v35 }
 0x110   : > { %v1581_v36 = vpop.f32.mrf.mxu0  ;;  %v609_v37 = vpop.f32.mrf.mxu1 }
 0x111   : > { %767 = vst [vmem:[%s1571_s22 + $0x8] sm:$0xff] %v1581_v36  ;;  %v900_v32 = vmul.f32 %v1581_v36, %v1581_v36 }
 0x112   : > { %v454_v38 = vpop.f32.mrf.mxu0  ;;  %v1585_v39 = vpop.f32.mrf.mxu1 }
 0x113   : > { %799 = vst [vmem:[%s1571_s22 + $0x108] sm:$0xff] %v1585_v39  ;;  %v899_v38 = vmul.f32 %v1573_v33, %v1573_v33 }
 0x114   : > { %v1589_v40 = vpop.f32.mrf.mxu0  ;;  %v614_v41 = vpop.f32.mrf.mxu1 }
 0x115   : > { %768 = vst [vmem:[%s1571_s22 + $0x10] sm:$0xff] %v1589_v40  ;;  %v830_v41 = vadd.f32 %v1581_v36, %v1573_v33 }
 0x116   : > { %v459_v42 = vpop.f32.mrf.mxu0  ;;  %v1593_v43 = vpop.f32.mrf.mxu1 }
 0x117   : > { %800 = vst [vmem:[%s1571_s22 + $0x110] sm:$0xff] %v1593_v43  ;;  %v901_v42 = vmul.f32 %v1589_v40, %v1589_v40 }
 0x118   : > { %v1597_v44 = vpop.f32.mrf.mxu0  ;;  %v619_v45 = vpop.f32.mrf.mxu1 }
 0x119   : > { %769 = vst [vmem:[%s1571_s22 + $0x18] sm:$0xff] %v1597_v44 }
 0x11a   : > { %v464_v46 = vpop.f32.mrf.mxu0  ;;  %v1601_v47 = vpop.f32.mrf.mxu1 }
 0x11b   : > { %801 = vst [vmem:[%s1571_s22 + $0x118] sm:$0xff] %v1601_v47 }
 0x11c   : > { %v1605_v48 = vpop.f32.mrf.mxu0  ;;  %v624_v49 = vpop.f32.mrf.mxu1 }
 0x11d   : > { %770 = vst [vmem:[%s1571_s22 + $0x20] sm:$0xff] %v1605_v48  ;;  %v963_v49 = vadd.f32 %v900_v32, %v899_v38 }
 0x11e   : > { %v469_v50 = vpop.f32.mrf.mxu0  ;;  %v1609_v51 = vpop.f32.mrf.mxu1 }
 0x11f   : > { %802 = vst [vmem:[%s1571_s22 + $0x120] sm:$0xff] %v1609_v51  ;;  %v831_v50 = vadd.f32 %v830_v41, %v1589_v40  ;;  %v964_v36 = vadd.f32 %v963_v49, %v901_v42 }
 0x120   : > { %v1613_v52 = vpop.f32.mrf.mxu0  ;;  %v629_v53 = vpop.f32.mrf.mxu1 }
 0x121   : > { %771 = vst [vmem:[%s1571_s22 + $0x28] sm:$0xff] %v1613_v52  ;;  %v902_v53 = vmul.f32 %v1597_v44, %v1597_v44 }
 0x122   : > { %v474_v54 = vpop.f32.mrf.mxu0  ;;  %v1617_v55 = vpop.f32.mrf.mxu1 }
 0x123   : > { %803 = vst [vmem:[%s1571_s22 + $0x128] sm:$0xff] %v1617_v55  ;;  %v965_v40 = vadd.f32 %v964_v36, %v902_v53 }
 0x124   : > { %v1621_v56 = vpop.f32.mrf.mxu0  ;;  %v634_v57 = vpop.f32.mrf.mxu1 }
 0x125   : > { %772 = vst [vmem:[%s1571_s22 + $0x30] sm:$0xff] %v1621_v56  ;;  %v832_v57 = vadd.f32 %v831_v50, %v1597_v44 }
 0x126   : > { %v479_v58 = vpop.f32.mrf.mxu0  ;;  %v1625_v59 = vpop.f32.mrf.mxu1 }
 0x127   : > { %804 = vst [vmem:[%s1571_s22 + $0x130] sm:$0xff] %v1625_v59  ;;  %v903_v58 = vmul.f32 %v1605_v48, %v1605_v48 }
 0x128   : > { %v1629_v60 = vpop.f32.mrf.mxu0  ;;  %v639_v61 = vpop.f32.mrf.mxu1 }
 0x129   : > { %773 = vst [vmem:[%s1571_s22 + $0x38] sm:$0xff] %v1629_v60 }
 0x12a   : > { %v484_v62 = vpop.f32.mrf.mxu0  ;;  %v1633_v63 = vpop.f32.mrf.mxu1 }
 0x12b   : > { %805 = vst [vmem:[%s1571_s22 + $0x138] sm:$0xff] %v1633_v63 }
 0x12c   : > { %v1637_v0 = vpop.f32.mrf.mxu0  ;;  %v644_v1 = vpop.f32.mrf.mxu1 }
 0x12d   : > { %774 = vst [vmem:[%s1571_s22 + $0x40] sm:$0xff] %v1637_v0  ;;  %v833_v1 = vadd.f32 %v832_v57, %v1605_v48 }
 0x12e   : > { %v489_v2 = vpop.f32.mrf.mxu0  ;;  %v1641_v3 = vpop.f32.mrf.mxu1 }
 0x12f   : > { %806 = vst [vmem:[%s1571_s22 + $0x140] sm:$0xff] %v1641_v3  ;;  %v904_v2 = vmul.f32 %v1613_v52, %v1613_v52 }
 0x130   : > { %v1645_v4 = vpop.f32.mrf.mxu0  ;;  %v649_v5 = vpop.f32.mrf.mxu1 }
 0x131   : > { %775 = vst [vmem:[%s1571_s22 + $0x48] sm:$0xff] %v1645_v4 }
 0x132   : > { %v494_v6 = vpop.f32.mrf.mxu0  ;;  %v1649_v7 = vpop.f32.mrf.mxu1 }
 0x133   : > { %807 = vst [vmem:[%s1571_s22 + $0x148] sm:$0xff] %v1649_v7  ;;  %v966_v6 = vadd.f32 %v965_v40, %v903_v58 }
 0x134   : > { %v1653_v8 = vpop.f32.mrf.mxu0  ;;  %v654_v9 = vpop.f32.mrf.mxu1 }
 0x135   : > { %776 = vst [vmem:[%s1571_s22 + $0x50] sm:$0xff] %v1653_v8  ;;  %v834_v9 = vadd.f32 %v833_v1, %v1613_v52  ;;  %v967_v48 = vadd.f32 %v966_v6, %v904_v2 }
 0x136   : > { %v499_v10 = vpop.f32.mrf.mxu0  ;;  %v1657_v11 = vpop.f32.mrf.mxu1 }
 0x137   : > { %808 = vst [vmem:[%s1571_s22 + $0x150] sm:$0xff] %v1657_v11  ;;  %v905_v10 = vmul.f32 %v1621_v56, %v1621_v56 }
 0x138   : > { %v1661_v12 = vpop.f32.mrf.mxu0  ;;  %v659_v13 = vpop.f32.mrf.mxu1 }
 0x139   : > { %777 = vst [vmem:[%s1571_s22 + $0x58] sm:$0xff] %v1661_v12 }
 0x13a   : > { %v504_v14 = vpop.f32.mrf.mxu0  ;;  %v1665_v15 = vpop.f32.mrf.mxu1 }
 0x13b   : > { %809 = vst [vmem:[%s1571_s22 + $0x158] sm:$0xff] %v1665_v15 }
 0x13c   : > { %v1669_v16 = vpop.f32.mrf.mxu0  ;;  %v664_v17 = vpop.f32.mrf.mxu1 }
 0x13d   : > { %778 = vst [vmem:[%s1571_s22 + $0x60] sm:$0xff] %v1669_v16  ;;  %v835_v17 = vadd.f32 %v834_v9, %v1621_v56 }
 0x13e   : > { %v509_v18 = vpop.f32.mrf.mxu0  ;;  %v1673_v19 = vpop.f32.mrf.mxu1 }
 0x13f   : > { %810 = vst [vmem:[%s1571_s22 + $0x160] sm:$0xff] %v1673_v19  ;;  %v906_v18 = vmul.f32 %v1629_v60, %v1629_v60 }
 0x140   : > { %v1677_v20 = vpop.f32.mrf.mxu0  ;;  %v669_v21 = vpop.f32.mrf.mxu1 }
 0x141   : > { %779 = vst [vmem:[%s1571_s22 + $0x68] sm:$0xff] %v1677_v20 }
 0x142   : > { %v514_v22 = vpop.f32.mrf.mxu0  ;;  %v1681_v23 = vpop.f32.mrf.mxu1 }
 0x143   : > { %811 = vst [vmem:[%s1571_s22 + $0x168] sm:$0xff] %v1681_v23  ;;  %v968_v22 = vadd.f32 %v967_v48, %v905_v10 }
 0x144   : > { %v1685_v24 = vpop.f32.mrf.mxu0  ;;  %v674_v25 = vpop.f32.mrf.mxu1 }
 0x145   : > { %780 = vst [vmem:[%s1571_s22 + $0x70] sm:$0xff] %v1685_v24  ;;  %v836_v25 = vadd.f32 %v835_v17, %v1629_v60  ;;  %v969_v56 = vadd.f32 %v968_v22, %v906_v18 }
 0x146   : > { %v519_v26 = vpop.f32.mrf.mxu0  ;;  %v1689_v27 = vpop.f32.mrf.mxu1 }
 0x147   : > { %812 = vst [vmem:[%s1571_s22 + $0x170] sm:$0xff] %v1689_v27  ;;  %v907_v26 = vmul.f32 %v1637_v0, %v1637_v0  ;;  %v837_v32 = vadd.f32 %v836_v25, %v1637_v0 }
 0x148   : > { %v1693_v28 = vpop.f32.mrf.mxu0  ;;  %v679_v29 = vpop.f32.mrf.mxu1 }
 0x149   : > { %781 = vst [vmem:[%s1571_s22 + $0x78] sm:$0xff] %v1693_v28  ;;  %v970_v41 = vadd.f32 %v969_v56, %v907_v26  ;;  %v838_v42 = vadd.f32 %v837_v32, %v1645_v4 }
 0x14a   : > { %v524_v30 = vpop.f32.mrf.mxu0  ;;  %v1697_v31 = vpop.f32.mrf.mxu1 }
 0x14b   : > { %813 = vst [vmem:[%s1571_s22 + $0x178] sm:$0xff] %v1697_v31  ;;  %v839_v53 = vadd.f32 %v838_v42, %v1653_v8 }
 0x14c   : > { %v1703_v34 = vpop.f32.mrf.mxu0  ;;  %v684_v37 = vpop.f32.mrf.mxu1 }
 0x14d   : > { %782 = vst [vmem:[%s1571_s22 + $0x80] sm:$0xff] %v1703_v34  ;;  %v908_v37 = vmul.f32 %v1645_v4, %v1645_v4  ;;  %v840_v58 = vadd.f32 %v839_v53, %v1661_v12 }
 0x14e   : > { %v529_v45 = vpop.f32.mrf.mxu0  ;;  %v1713_v46 = vpop.f32.mrf.mxu1 }
 0x14f   : > { %814 = vst [vmem:[%s1571_s22 + $0x180] sm:$0xff] %v1713_v46  ;;  %v909_v45 = vmul.f32 %v1653_v8, %v1653_v8  ;;  %v971_v0 = vadd.f32 %v970_v41, %v908_v37  ;;  %v841_v2 = vadd.f32 %v840_v58, %v1669_v16 }
 0x150   : > { %v1720_v54 = vpop.f32.mrf.mxu0  ;;  %v689_v33 = vpop.f32.mrf.mxu1 }
 0x151   : > { %783 = vst [vmem:[%s1571_s22 + $0x88] sm:$0xff] %v1720_v54  ;;  %v910_v33 = vmul.f32 %v1661_v12, %v1661_v12  ;;  %v972_v57 = vadd.f32 %v971_v0, %v909_v45  ;;  %v842_v10 = vadd.f32 %v841_v2, %v1677_v20 }
 0x152   : > { %v534_v61 = vpop.f32.mrf.mxu0  ;;  %v1727_v62 = vpop.f32.mrf.mxu1 }
 0x153   : > { %815 = vst [vmem:[%s1571_s22 + $0x188] sm:$0xff] %v1727_v62  ;;  %v911_v61 = vmul.f32 %v1669_v16, %v1669_v16  ;;  %v973_v8 = vadd.f32 %v972_v57, %v910_v33  ;;  %v843_v18 = vadd.f32 %v842_v10, %v1685_v24 }
 0x154   : > { %v1734_v5 = vpop.f32.mrf.mxu0  ;;  %v694_v44 = vpop.f32.mrf.mxu1 }
 0x155   : > { %784 = vst [vmem:[%s1571_s22 + $0x90] sm:$0xff] %v1734_v5  ;;  %v912_v44 = vmul.f32 %v1677_v20, %v1677_v20  ;;  %v974_v12 = vadd.f32 %v973_v8, %v911_v61  ;;  %v844_v26 = vadd.f32 %v843_v18, %v1693_v28 }
 0x156   : > { %v539_v13 = vpop.f32.mrf.mxu0  ;;  %v1741_v14 = vpop.f32.mrf.mxu1 }
 0x157   : > { %816 = vst [vmem:[%s1571_s22 + $0x190] sm:$0xff] %v1741_v14  ;;  %v913_v13 = vmul.f32 %v1685_v24, %v1685_v24  ;;  %v975_v16 = vadd.f32 %v974_v12, %v912_v44  ;;  %v845_v37 = vadd.f32 %v844_v26, %v1703_v34 }
 0x158   : > { %v1748_v21 = vpop.f32.mrf.mxu0  ;;  %v699_v52 = vpop.f32.mrf.mxu1 }
 0x159   : > { %785 = vst [vmem:[%s1571_s22 + $0x98] sm:$0xff] %v1748_v21  ;;  %v914_v52 = vmul.f32 %v1693_v28, %v1693_v28  ;;  %v976_v20 = vadd.f32 %v975_v16, %v913_v13  ;;  %v846_v45 = vadd.f32 %v845_v37, %v1720_v54 }
 0x15a   : > { %v544_v29 = vpop.f32.mrf.mxu0  ;;  %v1755_v30 = vpop.f32.mrf.mxu1 }
 0x15b   : > { %817 = vst [vmem:[%s1571_s22 + $0x198] sm:$0xff] %v1755_v30  ;;  %v915_v29 = vmul.f32 %v1703_v34, %v1703_v34  ;;  %v977_v24 = vadd.f32 %v976_v20, %v914_v52  ;;  %v847_v33 = vadd.f32 %v846_v45, %v1734_v5 }
 0x15c   : > { %v1762_v38 = vpop.f32.mrf.mxu0  ;;  %v704_v60 = vpop.f32.mrf.mxu1 }
 0x15d   : > { %786 = vst [vmem:[%s1571_s22 + $0xa0] sm:$0xff] %v1762_v38  ;;  %v916_v60 = vmul.f32 %v1720_v54, %v1720_v54  ;;  %v978_v28 = vadd.f32 %v977_v24, %v915_v29  ;;  %v848_v61 = vadd.f32 %v847_v33, %v1748_v21 }
 0x15e   : > { %v549_v49 = vpop.f32.mrf.mxu0  ;;  %v1769_v50 = vpop.f32.mrf.mxu1 }
 0x15f   : > { %818 = vst [vmem:[%s1571_s22 + $0x1a0] sm:$0xff] %v1769_v50  ;;  %v917_v49 = vmul.f32 %v1734_v5, %v1734_v5  ;;  %v979_v34 = vadd.f32 %v978_v28, %v916_v60  ;;  %v849_v44 = vadd.f32 %v848_v61, %v1762_v38 }
 0x160   : > { %v1776_v36 = vpop.f32.mrf.mxu0  ;;  %v709_v4 = vpop.f32.mrf.mxu1 }
 0x161   : > { %787 = vst [vmem:[%s1571_s22 + $0xa8] sm:$0xff] %v1776_v36  ;;  %v918_v4 = vmul.f32 %v1748_v21, %v1748_v21  ;;  %v980_v54 = vadd.f32 %v979_v34, %v917_v49  ;;  %v850_v13 = vadd.f32 %v849_v44, %v1776_v36 }
 0x162   : > { %v554_v40 = vpop.f32.mrf.mxu0  ;;  %v1783_v1 = vpop.f32.mrf.mxu1 }
 0x163   : > { %819 = vst [vmem:[%s1571_s22 + $0x1a8] sm:$0xff] %v1783_v1  ;;  %v919_v40 = vmul.f32 %v1762_v38, %v1762_v38  ;;  %v981_v5 = vadd.f32 %v980_v54, %v918_v4 }
 0x164   : > { %v557_v6 = vpop.f32.mrf.mxu0  ;;  %v714_v9 = vpop.f32.mrf.mxu1 }
 0x165   : > { %788 = vst [vmem:[%s1571_s22 + $0xb0] sm:$0xff] %v557_v6  ;;  %v920_v9 = vmul.f32 %v1776_v36, %v1776_v36  ;;  %v982_v21 = vadd.f32 %v981_v5, %v919_v40 }
 0x166   : > { %v559_v48 = vpop.f32.mrf.mxu0  ;;  %v1794_v17 = vpop.f32.mrf.mxu1 }
 0x167   : > { %820 = vst [vmem:[%s1571_s22 + $0x1b0] sm:$0xff] %v1794_v17  ;;  %v921_v48 = vmul.f32 %v557_v6, %v557_v6  ;;  %v983_v52 = vadd.f32 %v982_v21, %v920_v9 }
 0x168   : > { %v562_v22 = vpop.f32.mrf.mxu0  ;;  %v719_v25 = vpop.f32.mrf.mxu1 }
 0x169   : > { %789 = vst [vmem:[%s1571_s22 + $0xb8] sm:$0xff] %v562_v22  ;;  %v851_v25 = vadd.f32 %v850_v13, %v557_v6  ;;  %v922_v38 = vmul.f32 %v562_v22, %v562_v22  ;;  %v984_v29 = vadd.f32 %v983_v52, %v921_v48 }
 0x16a   : > { %v564_v56 = vpop.f32.mrf.mxu0  ;;  %v1805_v32 = vpop.f32.mrf.mxu1 }
 0x16b   : > { %821 = vst [vmem:[%s1571_s22 + $0x1b8] sm:$0xff] %v1805_v32  ;;  %v852_v56 = vadd.f32 %v851_v25, %v562_v22  ;;  %v985_v60 = vadd.f32 %v984_v29, %v922_v38 }
 0x16c   : > { %v567_v41 = vpop.f32.mrf.mxu0  ;;  %v724_v42 = vpop.f32.mrf.mxu1 }
 0x16d   : > { %790 = vst [vmem:[%s1571_s22 + $0xc0] sm:$0xff] %v567_v41  ;;  %v923_v24 = vmul.f32 %v567_v41, %v567_v41  ;;  %v853_v42 = vadd.f32 %v852_v56, %v567_v41 }
 0x16e   : > { %v569_v0 = vpop.f32.mrf.mxu0  ;;  %v1816_v53 = vpop.f32.mrf.mxu1 }
 0x16f   : > { %822 = vst [vmem:[%s1571_s22 + $0x1c0] sm:$0xff] %v1816_v53  ;;  %v986_v49 = vadd.f32 %v985_v60, %v923_v24 }
 0x170   : > { %v572_v57 = vpop.f32.mrf.mxu0  ;;  %v729_v58 = vpop.f32.mrf.mxu1 }
 0x171   : > { %791 = vst [vmem:[%s1571_s22 + $0xc8] sm:$0xff] %v572_v57  ;;  %v924_v28 = vmul.f32 %v572_v57, %v572_v57  ;;  %v854_v0 = vadd.f32 %v853_v42, %v572_v57 }
 0x172   : > { %v574_v8 = vpop.f32.mrf.mxu0  ;;  %v1827_v2 = vpop.f32.mrf.mxu1 }
 0x173   : > { %823 = vst [vmem:[%s1571_s22 + $0x1c8] sm:$0xff] %v1827_v2  ;;  %v987_v4 = vadd.f32 %v986_v49, %v924_v28 }
 0x174   : > { %v577_v12 = vpop.f32.mrf.mxu0  ;;  %v734_v10 = vpop.f32.mrf.mxu1 }
 0x175   : > { %792 = vst [vmem:[%s1571_s22 + $0xd0] sm:$0xff] %v577_v12  ;;  %v925_v34 = vmul.f32 %v577_v12, %v577_v12  ;;  %v855_v58 = vadd.f32 %v854_v0, %v577_v12 }
 0x176   : > { %v579_v16 = vpop.f32.mrf.mxu0  ;;  %v1836_v18 = vpop.f32.mrf.mxu1 }
 0x177   : > { %824 = vst [vmem:[%s1571_s22 + $0x1d0] sm:$0xff] %v1836_v18  ;;  %v988_v40 = vadd.f32 %v987_v4, %v925_v34  ;;  %v932_v34 = vmul.f32 %v1585_v39, %v1585_v39 }
 0x178   : > { %v582_v20 = vpop.f32.mrf.mxu0  ;;  %v739_v26 = vpop.f32.mrf.mxu1 }
 0x179   : > { %793 = vst [vmem:[%s1571_s22 + $0xd8] sm:$0xff] %v582_v20  ;;  %v926_v54 = vmul.f32 %v582_v20, %v582_v20  ;;  %v856_v8 = vadd.f32 %v855_v58, %v582_v20  ;;  %v933_v58 = vmul.f32 %v1593_v43, %v1593_v43 }
 0x17a   : > { %v584_v37 = vpop.f32.mrf.mxu0  ;;  %v1841_v36 = vpop.f32.mrf.mxu1 }
 0x17b   : > { %825 = vst [vmem:[%s1571_s22 + $0x1d8] sm:$0xff] %v1841_v36  ;;  %v989_v9 = vadd.f32 %v988_v40, %v926_v54 }
 0x17c   : > { %v587_v6 = vpop.f32.mrf.mxu0  ;;  %v744_v45 = vpop.f32.mrf.mxu1 }
 0x17d   : > { %794 = vst [vmem:[%s1571_s22 + $0xe0] sm:$0xff] %v587_v6  ;;  %v927_v5 = vmul.f32 %v587_v6, %v587_v6  ;;  %v857_v10 = vadd.f32 %v856_v8, %v587_v6  ;;  %v931_v6 = vmul.f32 %v1577_v35, %v1577_v35  ;;  %v935_v8 = vmul.f32 %v1609_v51, %v1609_v51 }
 0x17e   : > { %v589_v33 = vpop.f32.mrf.mxu0  ;;  %v1846_v22 = vpop.f32.mrf.mxu1 }
 0x17f   : > { %826 = vst [vmem:[%s1571_s22 + $0x1e0] sm:$0xff] %v1846_v22  ;;  %v990_v48 = vadd.f32 %v989_v9, %v927_v5 }
 0x180   : > { %v592_v41 = vpop.f32.mrf.mxu0  ;;  %v749_v61 = vpop.f32.mrf.mxu1 }
 0x181   : > { %795 = vst [vmem:[%s1571_s22 + $0xe8] sm:$0xff] %v592_v41  ;;  %v928_v21 = vmul.f32 %v592_v41, %v592_v41  ;;  %v858_v16 = vadd.f32 %v857_v10, %v592_v41  ;;  %v934_v61 = vmul.f32 %v1601_v47, %v1601_v47 }
 0x182   : > { %v594_v44 = vpop.f32.mrf.mxu0  ;;  %v1851_v57 = vpop.f32.mrf.mxu1 }
 0x183   : > { %827 = vst [vmem:[%s1571_s22 + $0x1e8] sm:$0xff] %v1851_v57  ;;  %v991_v20 = vadd.f32 %v990_v48, %v928_v21 }
 0x184   : > { %v597_v12 = vpop.f32.mrf.mxu0  ;;  %v754_v13 = vpop.f32.mrf.mxu1 }
 0x185   : > { %796 = vst [vmem:[%s1571_s22 + $0xf0] sm:$0xff] %v597_v12  ;;  %v929_v52 = vmul.f32 %v597_v12, %v597_v12  ;;  %v859_v26 = vadd.f32 %v858_v16, %v597_v12 }
 0x186   : > { %v599_v25 = vpop.f32.mrf.mxu0  ;;  %v1856_v38 = vpop.f32.mrf.mxu1 }
 0x187   : > { %828 = vst [vmem:[%s1571_s22 + $0x1f0] sm:$0xff] %v1856_v38  ;;  %v992_v24 = vadd.f32 %v991_v20, %v929_v52 }
 0x188   : > { %v602_v29 = vpop.f32.mrf.mxu0  ;;  %v759_v56 = vpop.f32.mrf.mxu1 }
 0x189   : > { %797 = vst [vmem:[%s1571_s22 + $0xf8] sm:$0xff] %v602_v29  ;;  %v860_v37 = vadd.f32 %v859_v26, %v602_v29  ;;  %v930_v60 = vmul.f32 %v602_v29, %v602_v29 }
 0x18a   : > { %v604_v42 = vpop.f32.mrf.mxu0  ;;  %v1861_v28 = vpop.f32.mrf.mxu1 }
 0x18b   : > { %v861_v45 = vadd.f32 %v860_v37, %v1577_v35  ;;  %v993_v49 = vadd.f32 %v992_v24, %v930_v60  ;;  %829 = vst [vmem:[%s1571_s22 + $0x1f8] sm:$0xff] %v1861_v28 }
 0x18c   : > { %v764_v0 = vpop.f32.mrf.mxu1 }
 0x18d   : > { %v862_v33 = vadd.f32 %v861_v45, %v1585_v39  ;;  %v994_v4 = vadd.f32 %v993_v49, %v931_v6  ;;  %v936_v39 = vmul.f32 %v1617_v55, %v1617_v55 }
 0x18f   : > { %v863_v54 = vadd.f32 %v862_v33, %v1593_v43  ;;  %v995_v41 = vadd.f32 %v994_v4, %v932_v34  ;;  %v937_v43 = vmul.f32 %v1625_v59, %v1625_v59  ;;  %v947_v33 = vmul.f32 %v1713_v46, %v1713_v46 }
 0x191   : > { %v864_v35 = vadd.f32 %v863_v54, %v1601_v47  ;;  %v996_v40 = vadd.f32 %v995_v41, %v933_v58  ;;  %v938_v47 = vmul.f32 %v1633_v63, %v1633_v63  ;;  %v948_v54 = vmul.f32 %v1727_v62, %v1727_v62 }
 0x193   : > { %v865_v5 = vadd.f32 %v864_v35, %v1609_v51  ;;  %v997_v44 = vadd.f32 %v996_v40, %v934_v61  ;;  %v939_v51 = vmul.f32 %v1641_v3, %v1641_v3  ;;  %v949_v61 = vmul.f32 %v1741_v14, %v1741_v14 }
 0x194   : > { %v950_v40 = vmul.f32 %v1755_v30, %v1755_v30 }
 0x195   : > { %v866_v9 = vadd.f32 %v865_v5, %v1617_v55  ;;  %v998_v10 = vadd.f32 %v997_v44, %v935_v8  ;;  %v940_v55 = vmul.f32 %v1649_v7, %v1649_v7  ;;  %v951_v5 = vmul.f32 %v1769_v50, %v1769_v50 }
 0x197   : > { %v867_v21 = vadd.f32 %v866_v9, %v1625_v59  ;;  %v999_v12 = vadd.f32 %v998_v10, %v936_v39  ;;  %v941_v59 = vmul.f32 %v1657_v11, %v1657_v11  ;;  %v952_v39 = vmul.f32 %v1783_v1, %v1783_v1 }
 0x198   : > { %v953_v10 = vmul.f32 %v1794_v17, %v1794_v17 }
 0x199   : > { %v868_v13 = vadd.f32 %v867_v21, %v1633_v63  ;;  %v1000_v48 = vadd.f32 %v999_v12, %v937_v43  ;;  %v942_v63 = vmul.f32 %v1665_v15, %v1665_v15  ;;  %v954_v21 = vmul.f32 %v1805_v32, %v1805_v32 }
 0x19b   : > { %v1001_v16 = vadd.f32 %v1000_v48, %v938_v47  ;;  %v869_v52 = vadd.f32 %v868_v13, %v1641_v3  ;;  %v943_v3 = vmul.f32 %v1673_v19, %v1673_v19  ;;  %v955_v47 = vmul.f32 %v1816_v53, %v1816_v53 }
 0x19c   : > { %v956_v48 = vmul.f32 %v1827_v2, %v1827_v2 }
 0x19d   : > { %v870_v25 = vadd.f32 %v869_v52, %v1649_v7  ;;  %v1002_v20 = vadd.f32 %v1001_v16, %v939_v51  ;;  %v944_v7 = vmul.f32 %v1681_v23, %v1681_v23  ;;  %v957_v16 = vmul.f32 %v1836_v18, %v1836_v18 }
 0x19f   : > { %v871_v26 = vadd.f32 %v870_v25, %v1657_v11  ;;  %v1003_v29 = vadd.f32 %v1002_v20, %v940_v55  ;;  %v945_v11 = vmul.f32 %v1689_v27, %v1689_v27  ;;  %v958_v55 = vmul.f32 %v1841_v36, %v1841_v36 }
 0x1a0   : > { %v959_v20 = vmul.f32 %v1846_v22, %v1846_v22 }
 0x1a1   : > { %v872_v56 = vadd.f32 %v871_v26, %v1665_v15  ;;  %v1004_v24 = vadd.f32 %v1003_v29, %v941_v59  ;;  %v946_v15 = vmul.f32 %v1697_v31, %v1697_v31 }
 0x1a3   : > { %v873_v37 = vadd.f32 %v872_v56, %v1673_v19  ;;  %v1005_v60 = vadd.f32 %v1004_v24, %v942_v63  ;;  %v961_v63 = vmul.f32 %v1856_v38, %v1856_v38 }
 0x1a5   : > { %v874_v42 = vadd.f32 %v873_v37, %v1681_v23  ;;  %v1006_v6 = vadd.f32 %v1005_v60, %v943_v3 }
 0x1a7   : > { %v875_v45 = vadd.f32 %v874_v42, %v1689_v27  ;;  %v1007_v49 = vadd.f32 %v1006_v6, %v944_v7 }
 0x1a9   : > { %v876_v0 = vadd.f32 %v875_v45, %v1697_v31  ;;  %v1008_v34 = vadd.f32 %v1007_v49, %v945_v11 }
 0x1ab   : > { %v877_v19 = vadd.f32 %v876_v0, %v1713_v46  ;;  %v1009_v4 = vadd.f32 %v1008_v34, %v946_v15 }
 0x1ad   : > { %v1010_v23 = vadd.f32 %v1009_v4, %v947_v33  ;;  %v878_v58 = vadd.f32 %v877_v19, %v1727_v62 }
 0x1af   : > { %v1011_v27 = vadd.f32 %v1010_v23, %v948_v54  ;;  %v879_v41 = vadd.f32 %v878_v58, %v1741_v14 }
 0x1b1   : > { %v1012_v31 = vadd.f32 %v1011_v27, %v949_v61  ;;  %v880_v35 = vadd.f32 %v879_v41, %v1755_v30 }
 0x1b3   : > { %v1013_v46 = vadd.f32 %v1012_v31, %v950_v40  ;;  %v881_v8 = vadd.f32 %v880_v35, %v1769_v50 }
 0x1b5   : > { %v1014_v44 = vadd.f32 %v1013_v46, %v951_v5  ;;  %v882_v62 = vadd.f32 %v881_v8, %v1783_v1 }
 0x1b7   : > { %v1015_v9 = vadd.f32 %v1014_v44, %v952_v39  ;;  %v883_v14 = vadd.f32 %v882_v62, %v1794_v17 }
 0x1b9   : > { %v1016_v43 = vadd.f32 %v1015_v9, %v953_v10  ;;  %v884_v30 = vadd.f32 %v883_v14, %v1805_v32 }
 0x1bb   : > { %v1017_v12 = vadd.f32 %v1016_v43, %v954_v21  ;;  %v885_v50 = vadd.f32 %v884_v30, %v1816_v53 }
 0x1bd   : > { %v1018_v13 = vadd.f32 %v1017_v12, %v955_v47  ;;  %v886_v1 = vadd.f32 %v885_v50, %v1827_v2 }
 0x1bf   : > { %v1019_v51 = vadd.f32 %v1018_v13, %v956_v48  ;;  %v887_v17 = vadd.f32 %v886_v1, %v1836_v18  ;;  %v960_v18 = vmul.f32 %v1851_v57, %v1851_v57 }
 0x1c1   : > { %v1020_v52 = vadd.f32 %v1019_v51, %v957_v16  ;;  %v888_v32 = vadd.f32 %v887_v17, %v1841_v36  ;;  %v962_v36 = vmul.f32 %v1861_v28, %v1861_v28 }
 0x1c3   : > { %v1021_v53 = vadd.f32 %v1020_v52, %v958_v55  ;;  %v889_v25 = vadd.f32 %v888_v32, %v1846_v22 }
 0x1c5   : > { %v1022_v2 = vadd.f32 %v1021_v53, %v959_v20  ;;  %v890_v59 = vadd.f32 %v889_v25, %v1851_v57 }
 0x1c7   : > { %v1023_v26 = vadd.f32 %v1022_v2, %v960_v18  ;;  %v891_v29 = vadd.f32 %v890_v59, %v1856_v38 }
 0x1c9   : > { %v1024_v56 = vadd.f32 %v1023_v26, %v961_v63  ;;  %v892_v24 = vadd.f32 %v891_v29, %v1861_v28 }
 0x1cb   : > { %v893_v22 = vrot.slane %v892_v24, 4  ;;  %v1025_v3 = vadd.f32 %v1024_v56, %v962_v36 }
 0x1cd   : > { %v894_v37 = vadd.f32 %v893_v22, %v892_v24  ;;  %v1026_v60 = vrot.slane %v1025_v3, 4 }
 0x1cf   : > { %v895_v7 = vrot.slane %v894_v37, 2  ;;  %v1027_v42 = vadd.f32 %v1026_v60, %v1025_v3 }
 0x1d1   : > { %v896_v57 = vadd.f32 %v895_v7, %v894_v37  ;;  %v1028_v6 = vrot.slane %v1027_v42, 2 }
 0x1d3   : > { %v897_v11 = vrot.slane %v896_v57, 1  ;;  %v1029_v45 = vadd.f32 %v1028_v6, %v1027_v42 }
 0x1d5   : > { %v898_v38 = vadd.f32 %v897_v11, %v896_v57  ;;  %v1030_v49 = vrot.slane %v1029_v45, 1 }
 0x1d7   : > { %v1031_v28 = vadd.f32 %v1030_v49, %v1029_v45  ;;  %1032 = vst [vmem:[%s217_s23] sm:$0x1] %v898_v38 }
 0x1d9   : > { %1033 = vst [vmem:[%s220_s26] sm:$0x1] %v1031_v28 }
 0x1da PF: > { %s15_s15 = sadd.s32 1, %s1232_s15  }
 0x1db   : > { %p12_p5 = scmp.ge.s32.totalorder %s15_s15, 4  }
 0x1dd   :  { %14 = sbr.rel (!%p12_p5) target bundleno = 1 (0x1), region = 82 }

</bundles_post_ra>
